<compile_context>
chip_gen: v5e
topology: v5e:2x2
jax: 0.10.0
libtpu: 0.0.40
codegen_flags: <defaults>
</compile_context>

<pallas_src>
import math

import jax
import jax.numpy as jnp
from jax.experimental import pallas as pl
from jax.experimental.pallas import tpu as pltpu

# ---------------- config (small synthetic BERT) ----------------
VOCAB = 100
HIDDEN = 32
N_LAYERS = 2
N_HEADS = 4
HEAD_DIM = HIDDEN // N_HEADS
INTERMEDIATE = 64
MAX_POS = 16
TYPE_VOCAB = 2
N_CLASSES = 3
CLS_PAD = 128                      # classifier logits padded to one full 128-lane vreg
LN_EPS = 1e-12
ATTN_SCALE = 1.0 / math.sqrt(HEAD_DIM)


# ---------------- in-kernel helpers (f32 math) ----------------
def _ln(x, g, b):
    mu = jnp.mean(x, axis=-1, keepdims=True)
    var = jnp.mean(jnp.square(x - mu), axis=-1, keepdims=True)
    return (x - mu) * jax.lax.rsqrt(var + LN_EPS) * g + b


# ---------------- fused encoder-layer kernel (one pallas_call per layer) ----------------
def _encoder_layer_kernel(x_ref, m_ref,
                          qkv_w_ref, qkv_b_ref, ao_w_ref, ao_b_ref,
                          ln1_g_ref, ln1_b_ref, i_w_ref, i_b_ref,
                          o_w_ref, o_b_ref, ln2_g_ref, ln2_b_ref,
                          o_ref):
    x = x_ref[0]                    # (S, H) f32 residual stream
    m = m_ref[0]                    # (1, S) additive attention mask (broadcast over queries)

    # fused QKV projection: bf16 operands, f32 accumulation
    qkv = jnp.dot(x.astype(jnp.bfloat16), qkv_w_ref[...],
                  preferred_element_type=jnp.float32) + qkv_b_ref[...]   # (S, 3H) f32

    # multi-head attention for ALL heads in this block; head-blocked static
    # slices keep the lane axis at H and the per-head context is folded
    # directly into the attention-output projection (no concat / reshape).
    ao_w = ao_w_ref[...]            # (H, H) bf16
    attn = jnp.zeros(x.shape, jnp.float32)
    for h in range(N_HEADS):
        lo = h * HEAD_DIM
        qh = qkv[:, lo:lo + HEAD_DIM]
        kh = qkv[:, HIDDEN + lo:HIDDEN + lo + HEAD_DIM]
        vh = qkv[:, 2 * HIDDEN + lo:2 * HIDDEN + lo + HEAD_DIM]
        s = jax.lax.dot_general(qh.astype(jnp.bfloat16), kh.astype(jnp.bfloat16),
                                (((1,), (1,)), ((), ())),
                                preferred_element_type=jnp.float32)       # (S, S)
        s = s * ATTN_SCALE + m
        s = s - jnp.max(s, axis=-1, keepdims=True)                        # f32 softmax stats
        p = jnp.exp(s)
        p = p * pl.reciprocal(jnp.sum(p, axis=-1, keepdims=True), approx=True)
        ctx = jnp.dot(p.astype(jnp.bfloat16), vh.astype(jnp.bfloat16),
                      preferred_element_type=jnp.float32)                 # (S, Dh)
        attn = attn + jnp.dot(ctx.astype(jnp.bfloat16), ao_w[lo:lo + HEAD_DIM, :],
                              preferred_element_type=jnp.float32)         # (S, H)
    attn = attn + ao_b_ref[...]

    # residual add fused into LayerNorm 1
    h1 = _ln(x + attn, ln1_g_ref[...], ln1_b_ref[...])

    # feed-forward (GELU); residual add fused into LayerNorm 2
    inter = jnp.dot(h1.astype(jnp.bfloat16), i_w_ref[...],
                    preferred_element_type=jnp.float32) + i_b_ref[...]
    # TODO(synk): HF BERT uses erf-based gelu; tanh approximation used for robust TPU lowering.
    inter = jax.nn.gelu(inter, approximate=True)
    ffn = jnp.dot(inter.astype(jnp.bfloat16), o_w_ref[...],
                  preferred_element_type=jnp.float32) + o_b_ref[...]
    o_ref[0] = _ln(h1 + ffn, ln2_g_ref[...], ln2_b_ref[...]).astype(o_ref.dtype)


def _rep_spec(shape):
    """Full-array block that is resident across all grid steps (weights)."""
    nd = len(shape)
    return pl.BlockSpec(shape, lambda b, _nd=nd: (0,) * _nd)


def pallas_encoder_layer(x, add_mask, lp):
    """x: (B, S, H) f32; add_mask: (B, 1, S) f32 additive mask."""
    B, S, H = x.shape
    return pl.pallas_call(
        _encoder_layer_kernel,
        out_shape=jax.ShapeDtypeStruct((B, S, H), jnp.float32),
        grid=(B,),
        in_specs=[
            pl.BlockSpec((1, S, H), lambda b: (b, 0, 0)),
            pl.BlockSpec((1, 1, S), lambda b: (b, 0, 0)),
            _rep_spec(lp["qkv_w"].shape), _rep_spec(lp["qkv_b"].shape),
            _rep_spec(lp["ao_w"].shape), _rep_spec(lp["ao_b"].shape),
            _rep_spec(lp["ln1_g"].shape), _rep_spec(lp["ln1_b"].shape),
            _rep_spec(lp["i_w"].shape), _rep_spec(lp["i_b"].shape),
            _rep_spec(lp["o_w"].shape), _rep_spec(lp["o_b"].shape),
            _rep_spec(lp["ln2_g"].shape), _rep_spec(lp["ln2_b"].shape),
        ],
        out_specs=pl.BlockSpec((1, S, H), lambda b: (b, 0, 0)),
        compiler_params=pltpu.CompilerParams(dimension_semantics=("parallel",)),
    )(x, add_mask, lp["qkv_w"], lp["qkv_b"], lp["ao_w"], lp["ao_b"],
      lp["ln1_g"], lp["ln1_b"], lp["i_w"], lp["i_b"], lp["o_w"], lp["o_b"],
      lp["ln2_g"], lp["ln2_b"])


# ---------------- embedding LayerNorm kernel (single launch, whole batch) ----------------
def _embed_ln_kernel(x_ref, g_ref, b_ref, o_ref):
    o_ref[...] = _ln(x_ref[...], g_ref[...], b_ref[...])


def pallas_embed_layernorm(x, gamma, beta):
    M, H = x.shape
    return pl.pallas_call(
        _embed_ln_kernel,
        out_shape=jax.ShapeDtypeStruct((M, H), jnp.float32),
        grid=(1,),
        in_specs=[
            pl.BlockSpec((M, H), lambda i: (0, 0)),
            pl.BlockSpec((1, H), lambda i: (0, 0)),
            pl.BlockSpec((1, H), lambda i: (0, 0)),
        ],
        out_specs=pl.BlockSpec((M, H), lambda i: (0, 0)),
    )(x, gamma, beta)


# ---------------- fused pooler(tanh) + dropout(identity) + classifier kernel ----------------
def _pooler_classifier_kernel(cls_ref, pw_ref, pb_ref, ow_ref, ob_ref, o_ref):
    pooled = jnp.tanh(jnp.dot(cls_ref[...].astype(jnp.bfloat16), pw_ref[...],
                              preferred_element_type=jnp.float32) + pb_ref[...])
    # Dropout(p=0.3) is identity at inference.
    o_ref[...] = jnp.dot(pooled.astype(jnp.bfloat16), ow_ref[...],
                         preferred_element_type=jnp.float32) + ob_ref[...]


def pallas_pooler_classifier(cls, pw, pb, ow_pad, ob_pad):
    B, H = cls.shape
    return pl.pallas_call(
        _pooler_classifier_kernel,
        out_shape=jax.ShapeDtypeStruct((B, CLS_PAD), jnp.float32),
        grid=(1,),
        in_specs=[
            pl.BlockSpec((B, H), lambda i: (0, 0)),
            pl.BlockSpec((H, H), lambda i: (0, 0)),
            pl.BlockSpec((1, H), lambda i: (0, 0)),
            pl.BlockSpec((H, CLS_PAD), lambda i: (0, 0)),
            pl.BlockSpec((1, CLS_PAD), lambda i: (0, 0)),
        ],
        out_specs=pl.BlockSpec((B, CLS_PAD), lambda i: (0, 0)),
    )(cls, pw, pb, ow_pad, ob_pad)


# ---------------- deterministic parameter init (fused / padded / bf16 layouts) ----------------
def init_params(key):
    def nrm(k, shape):
        return (jax.random.normal(k, shape) * 0.02).astype(jnp.float32)

    keys = iter(jax.random.split(key, 8 + 12 * N_LAYERS))
    p = {
        "word_emb": nrm(next(keys), (VOCAB, HIDDEN)),
        "pos_emb": nrm(next(keys), (MAX_POS, HIDDEN)),
        "type_emb": nrm(next(keys), (TYPE_VOCAB, HIDDEN)),
        "emb_ln_g": jnp.ones((1, HIDDEN), jnp.float32),
        "emb_ln_b": jnp.zeros((1, HIDDEN), jnp.float32),
        "pooler_w": nrm(next(keys), (HIDDEN, HIDDEN)).astype(jnp.bfloat16),
        "pooler_b": jnp.zeros((1, HIDDEN), jnp.float32),
    }
    out_w = nrm(next(keys), (HIDDEN, N_CLASSES))
    p["out_w_pad"] = jnp.pad(out_w, ((0, 0), (0, CLS_PAD - N_CLASSES))).astype(jnp.bfloat16)
    p["out_b_pad"] = jnp.zeros((1, CLS_PAD), jnp.float32)

    layers = []
    for _ in range(N_LAYERS):
        q_w = nrm(next(keys), (HIDDEN, HIDDEN))
        k_w = nrm(next(keys), (HIDDEN, HIDDEN))
        v_w = nrm(next(keys), (HIDDEN, HIDDEN))
        layers.append({
            "qkv_w": jnp.concatenate([q_w, k_w, v_w], axis=1).astype(jnp.bfloat16),
            "qkv_b": jnp.zeros((1, 3 * HIDDEN), jnp.float32),
            "ao_w": nrm(next(keys), (HIDDEN, HIDDEN)).astype(jnp.bfloat16),
            "ao_b": jnp.zeros((1, HIDDEN), jnp.float32),
            "ln1_g": jnp.ones((1, HIDDEN), jnp.float32),
            "ln1_b": jnp.zeros((1, HIDDEN), jnp.float32),
            "i_w": nrm(next(keys), (HIDDEN, INTERMEDIATE)).astype(jnp.bfloat16),
            "i_b": jnp.zeros((1, INTERMEDIATE), jnp.float32),
            "o_w": nrm(next(keys), (INTERMEDIATE, HIDDEN)).astype(jnp.bfloat16),
            "o_b": jnp.zeros((1, HIDDEN), jnp.float32),
            "ln2_g": jnp.ones((1, HIDDEN), jnp.float32),
            "ln2_b": jnp.zeros((1, HIDDEN), jnp.float32),
        })
    p["layers"] = layers
    return p


# ---------------- forward pass ----------------
def sentiment_classifier_forward(params, input_ids, attention_mask):
    B, S = input_ids.shape

    # --- BERT embeddings (gathers are glue; add + layernorm fused in one kernel launch) ---
    we = jnp.take(params["word_emb"], input_ids, axis=0)                   # (B,S,H)
    pe = params["pos_emb"][:S][None, :, :]                                 # (1,S,H)
    te = jnp.take(params["type_emb"], jnp.zeros_like(input_ids), axis=0)   # (B,S,H)
    emb = (we + pe + te).reshape(B * S, HIDDEN)
    x = pallas_embed_layernorm(emb, params["emb_ln_g"], params["emb_ln_b"])
    x = x.reshape(B, S, HIDDEN)

    # BERT-style additive attention mask: 0 where attended, -10000 where padded.
    add_mask = ((1.0 - attention_mask.astype(jnp.float32)) * -10000.0).reshape(B, 1, S)

    # --- BERT encoder: one fused pallas_call per layer ---
    for lp in params["layers"]:
        x = pallas_encoder_layer(x, add_mask, lp)

    # --- BERT pooler(tanh) + Dropout(identity at eval) + classifier head, fused ---
    cls = x[:, 0, :]                                                       # (B,H)
    logits_pad = pallas_pooler_classifier(cls, params["pooler_w"], params["pooler_b"],
                                          params["out_w_pad"], params["out_b_pad"])
    return logits_pad[:, :N_CLASSES]                                       # (B, n_classes)


if __name__ == "__main__":
    key = jax.random.PRNGKey(0)
    k_param, k_ids = jax.random.split(key)

    B, S = 2, 8
    params = init_params(k_param)
    input_ids = jax.random.randint(k_ids, (B, S), 0, VOCAB, dtype=jnp.int32)
    # second example has two padding tokens at the end
    attention_mask = jnp.array(
        [[1, 1, 1, 1, 1, 1, 1, 1],
         [1, 1, 1, 1, 1, 1, 0, 0]], dtype=jnp.int32)

    fwd = jax.jit(sentiment_classifier_forward)
    logits = fwd(params, input_ids, attention_mask)
    jax.block_until_ready(logits)
    assert logits.shape == (B, N_CLASSES)
    print("KERNEL_OK")
</pallas_src>

<mosaic_0001>
module attributes {stable_mosaic.version = 11 : i64} {
  func.func @_embed_ln_kernel(%arg0: i32, %arg1: memref<16x32xf32, #tpu.memory_space<vmem>>, %arg2: memref<1x32xf32, #tpu.memory_space<vmem>>, %arg3: memref<1x32xf32, #tpu.memory_space<vmem>>, %arg4: memref<16x32xf32, #tpu.memory_space<vmem>>) attributes {dimension_semantics = [#tpu.dimension_semantics<arbitrary>], iteration_bounds = array<i64: 1>, scalar_prefetch = 0 : i64, scratch_operands = 0 : i64, tpu.core_type = #tpu.core_type<tc>, window_params = [{pipeline_mode = #tpu.pipeline_mode<synchronous>, transform_indices = @transform_0, window_bounds = array<i64: 16, 32>}, {pipeline_mode = #tpu.pipeline_mode<synchronous>, transform_indices = @transform_1, window_bounds = array<i64: 1, 32>}, {pipeline_mode = #tpu.pipeline_mode<synchronous>, transform_indices = @transform_2, window_bounds = array<i64: 1, 32>}, {pipeline_mode = #tpu.pipeline_mode<synchronous>, transform_indices = @transform_3, window_bounds = array<i64: 16, 32>}]} {
    %c0 = arith.constant 0 : index
    %c0_0 = arith.constant 0 : index
    %0 = vector.load %arg1[%c0, %c0_0] : memref<16x32xf32, #tpu.memory_space<vmem>>, vector<16x32xf32>
    %c0_1 = arith.constant 0 : index
    %c0_2 = arith.constant 0 : index
    %1 = vector.load %arg2[%c0_1, %c0_2] : memref<1x32xf32, #tpu.memory_space<vmem>>, vector<1x32xf32>
    %c0_3 = arith.constant 0 : index
    %c0_4 = arith.constant 0 : index
    %2 = vector.load %arg3[%c0_3, %c0_4] : memref<1x32xf32, #tpu.memory_space<vmem>>, vector<1x32xf32>
    %cst = arith.constant dense<0.000000e+00> : vector<16xf32>
    %3 = vector.multi_reduction <add>, %0, %cst [1] : vector<16x32xf32> to vector<16xf32>
    %4 = vector.shape_cast %3 : vector<16xf32> to vector<16x1xf32>
    %cst_5 = arith.constant 3.200000e+01 : f32
    %5 = vector.broadcast %cst_5 : f32 to vector<16x1xf32>
    %6 = arith.divf %4, %5 : vector<16x1xf32>
    %7 = vector.broadcast %6 : vector<16x1xf32> to vector<16x32xf32>
    %8 = arith.subf %0, %7 : vector<16x32xf32>
    %9 = arith.mulf %8, %8 : vector<16x32xf32>
    %cst_6 = arith.constant dense<0.000000e+00> : vector<16xf32>
    %10 = vector.multi_reduction <add>, %9, %cst_6 [1] : vector<16x32xf32> to vector<16xf32>
    %11 = vector.shape_cast %10 : vector<16xf32> to vector<16x1xf32>
    %cst_7 = arith.constant 3.200000e+01 : f32
    %12 = vector.broadcast %cst_7 : f32 to vector<16x1xf32>
    %13 = arith.divf %11, %12 : vector<16x1xf32>
    %14 = vector.broadcast %6 : vector<16x1xf32> to vector<16x32xf32>
    %15 = arith.subf %0, %14 : vector<16x32xf32>
    %cst_8 = arith.constant 9.99999996E-13 : f32
    %16 = vector.broadcast %cst_8 : f32 to vector<16x1xf32>
    %17 = arith.addf %13, %16 : vector<16x1xf32>
    %18 = math.rsqrt %17 : vector<16x1xf32>
    %19 = vector.broadcast %18 : vector<16x1xf32> to vector<16x32xf32>
    %20 = arith.mulf %15, %19 : vector<16x32xf32>
    %21 = vector.broadcast %1 : vector<1x32xf32> to vector<16x32xf32>
    %22 = arith.mulf %20, %21 : vector<16x32xf32>
    %23 = vector.broadcast %2 : vector<1x32xf32> to vector<16x32xf32>
    %24 = arith.addf %22, %23 : vector<16x32xf32>
    %c0_9 = arith.constant 0 : index
    %c0_10 = arith.constant 0 : index
    %25 = vector.load %arg4[%c0_9, %c0_10] : memref<16x32xf32, #tpu.memory_space<vmem>>, vector<16x32xf32>
    tpu.vector_store %arg4[%c0_9, %c0_10], %24 {strides = array<i32>} : memref<16x32xf32, #tpu.memory_space<vmem>>, vector<16x32xf32>,
    return
  }
  func.func @transform_0(%arg0: i32) -> (i32, i32) {
    %c0_i32 = arith.constant 0 : i32
    %c0_i32_0 = arith.constant 0 : i32
    %c0_i32_1 = arith.constant 0 : i32
    return %c0_i32, %c0_i32_0 : i32, i32
  }
  func.func @transform_1(%arg0: i32) -> (i32, i32) {
    %c0_i32 = arith.constant 0 : i32
    %c0_i32_0 = arith.constant 0 : i32
    %c0_i32_1 = arith.constant 0 : i32
    return %c0_i32, %c0_i32_0 : i32, i32
  }
  func.func @transform_2(%arg0: i32) -> (i32, i32) {
    %c0_i32 = arith.constant 0 : i32
    %c0_i32_0 = arith.constant 0 : i32
    %c0_i32_1 = arith.constant 0 : i32
    return %c0_i32, %c0_i32_0 : i32, i32
  }
  func.func @transform_3(%arg0: i32) -> (i32, i32) {
    %c0_i32 = arith.constant 0 : i32
    %c0_i32_0 = arith.constant 0 : i32
    %c0_i32_1 = arith.constant 0 : i32
    return %c0_i32, %c0_i32_0 : i32, i32
  }
}

module attributes {stable_mosaic.version = 11 : i64} {
  func.func @_pooler_classifier_kernel(%arg0: i32, %arg1: memref<2x32xf32, #tpu.memory_space<vmem>>, %arg2: memref<32x32xbf16, #tpu.memory_space<vmem>>, %arg3: memref<1x32xf32, #tpu.memory_space<vmem>>, %arg4: memref<32x128xbf16, #tpu.memory_space<vmem>>, %arg5: memref<1x128xf32, #tpu.memory_space<vmem>>, %arg6: memref<2x128xf32, #tpu.memory_space<vmem>>) attributes {dimension_semantics = [#tpu.dimension_semantics<arbitrary>], iteration_bounds = array<i64: 1>, scalar_prefetch = 0 : i64, scratch_operands = 0 : i64, tpu.core_type = #tpu.core_type<tc>, window_params = [{pipeline_mode = #tpu.pipeline_mode<synchronous>, transform_indices = @transform_0, window_bounds = array<i64: 2, 32>}, {pipeline_mode = #tpu.pipeline_mode<synchronous>, transform_indices = @transform_1, window_bounds = array<i64: 32, 32>}, {pipeline_mode = #tpu.pipeline_mode<synchronous>, transform_indices = @transform_2, window_bounds = array<i64: 1, 32>}, {pipeline_mode = #tpu.pipeline_mode<synchronous>, transform_indices = @transform_3, window_bounds = array<i64: 32, 128>}, {pipeline_mode = #tpu.pipeline_mode<synchronous>, transform_indices = @transform_4, window_bounds = array<i64: 1, 128>}, {pipeline_mode = #tpu.pipeline_mode<synchronous>, transform_indices = @transform_5, window_bounds = array<i64: 2, 128>}]} {
    %c0 = arith.constant 0 : index
    %c0_0 = arith.constant 0 : index
    %0 = vector.load %arg1[%c0, %c0_0] : memref<2x32xf32, #tpu.memory_space<vmem>>, vector<2x32xf32>
    %1 = arith.truncf %0 : vector<2x32xf32> to vector<2x32xbf16>
    %c0_1 = arith.constant 0 : index
    %c0_2 = arith.constant 0 : index
    %2 = vector.load %arg2[%c0_1, %c0_2] : memref<32x32xbf16, #tpu.memory_space<vmem>>, vector<32x32xbf16>
    %cst = arith.constant dense<0.000000e+00> : vector<2x32xf32>
    %3 = tpu.matmul %1, %2, %cst {dimension_numbers = #tpu.dot_dimension_numbers<[1], [0], [0], [1], [0, 0, 1, 1], [], []>} : vector<2x32xbf16>, vector<32x32xbf16>, vector<2x32xf32> -> vector<2x32xf32>
    %c0_3 = arith.constant 0 : index
    %c0_4 = arith.constant 0 : index
    %4 = vector.load %arg3[%c0_3, %c0_4] : memref<1x32xf32, #tpu.memory_space<vmem>>, vector<1x32xf32>
    %5 = vector.broadcast %4 : vector<1x32xf32> to vector<2x32xf32>
    %6 = arith.addf %3, %5 : vector<2x32xf32>
    %7 = math.tanh %6 : vector<2x32xf32>
    %8 = arith.truncf %7 : vector<2x32xf32> to vector<2x32xbf16>
    %c0_5 = arith.constant 0 : index
    %c0_6 = arith.constant 0 : index
    %9 = vector.load %arg4[%c0_5, %c0_6] : memref<32x128xbf16, #tpu.memory_space<vmem>>, vector<32x128xbf16>
    %cst_7 = arith.constant dense<0.000000e+00> : vector<2x128xf32>
    %10 = tpu.matmul %8, %9, %cst_7 {dimension_numbers = #tpu.dot_dimension_numbers<[1], [0], [0], [1], [0, 0, 1, 1], [], []>} : vector<2x32xbf16>, vector<32x128xbf16>, vector<2x128xf32> -> vector<2x128xf32>
    %c0_8 = arith.constant 0 : index
    %c0_9 = arith.constant 0 : index
    %11 = vector.load %arg5[%c0_8, %c0_9] : memref<1x128xf32, #tpu.memory_space<vmem>>, vector<1x128xf32>
    %12 = vector.broadcast %11 : vector<1x128xf32> to vector<2x128xf32>
    %13 = arith.addf %10, %12 : vector<2x128xf32>
    %c0_10 = arith.constant 0 : index
    %c0_11 = arith.constant 0 : index
    %14 = vector.load %arg6[%c0_10, %c0_11] : memref<2x128xf32, #tpu.memory_space<vmem>>, vector<2x128xf32>
    tpu.vector_store %arg6[%c0_10, %c0_11], %13 {strides = array<i32>} : memref<2x128xf32, #tpu.memory_space<vmem>>, vector<2x128xf32>,
    return
  }
  func.func @transform_0(%arg0: i32) -> (i32, i32) {
    %c0_i32 = arith.constant 0 : i32
    %c0_i32_0 = arith.constant 0 : i32
    %c0_i32_1 = arith.constant 0 : i32
    return %c0_i32, %c0_i32_0 : i32, i32
  }
  func.func @transform_1(%arg0: i32) -> (i32, i32) {
    %c0_i32 = arith.constant 0 : i32
    %c0_i32_0 = arith.constant 0 : i32
    %c0_i32_1 = arith.constant 0 : i32
    return %c0_i32, %c0_i32_0 : i32, i32
  }
  func.func @transform_2(%arg0: i32) -> (i32, i32) {
    %c0_i32 = arith.constant 0 : i32
    %c0_i32_0 = arith.constant 0 : i32
    %c0_i32_1 = arith.constant 0 : i32
    return %c0_i32, %c0_i32_0 : i32, i32
  }
  func.func @transform_3(%arg0: i32) -> (i32, i32) {
    %c0_i32 = arith.constant 0 : i32
    %c0_i32_0 = arith.constant 0 : i32
    %c0_i32_1 = arith.constant 0 : i32
    return %c0_i32, %c0_i32_0 : i32, i32
  }
  func.func @transform_4(%arg0: i32) -> (i32, i32) {
    %c0_i32 = arith.constant 0 : i32
    %c0_i32_0 = arith.constant 0 : i32
    %c0_i32_1 = arith.constant 0 : i32
    return %c0_i32, %c0_i32_0 : i32, i32
  }
  func.func @transform_5(%arg0: i32) -> (i32, i32) {
    %c0_i32 = arith.constant 0 : i32
    %c0_i32_0 = arith.constant 0 : i32
    %c0_i32_1 = arith.constant 0 : i32
    return %c0_i32, %c0_i32_0 : i32, i32
  }
}

module attributes {stable_mosaic.version = 11 : i64} {
  func.func @_encoder_layer_kernel(%arg0: i32, %arg1: memref<1x8x32xf32, #tpu.memory_space<vmem>>, %arg2: memref<1x1x8xf32, #tpu.memory_space<vmem>>, %arg3: memref<32x96xbf16, #tpu.memory_space<vmem>>, %arg4: memref<1x96xf32, #tpu.memory_space<vmem>>, %arg5: memref<32x32xbf16, #tpu.memory_space<vmem>>, %arg6: memref<1x32xf32, #tpu.memory_space<vmem>>, %arg7: memref<1x32xf32, #tpu.memory_space<vmem>>, %arg8: memref<1x32xf32, #tpu.memory_space<vmem>>, %arg9: memref<32x64xbf16, #tpu.memory_space<vmem>>, %arg10: memref<1x64xf32, #tpu.memory_space<vmem>>, %arg11: memref<64x32xbf16, #tpu.memory_space<vmem>>, %arg12: memref<1x32xf32, #tpu.memory_space<vmem>>, %arg13: memref<1x32xf32, #tpu.memory_space<vmem>>, %arg14: memref<1x32xf32, #tpu.memory_space<vmem>>, %arg15: memref<1x8x32xf32, #tpu.memory_space<vmem>>) attributes {dimension_semantics = [#tpu.dimension_semantics<parallel>], iteration_bounds = array<i64: 2>, scalar_prefetch = 0 : i64, scratch_operands = 0 : i64, tpu.core_type = #tpu.core_type<tc>, window_params = [{transform_indices = @transform_0, window_bounds = array<i64: 1, 8, 32>}, {transform_indices = @transform_1, window_bounds = array<i64: 1, 1, 8>}, {pipeline_mode = #tpu.pipeline_mode<synchronous>, transform_indices = @transform_2, window_bounds = array<i64: 32, 96>}, {pipeline_mode = #tpu.pipeline_mode<synchronous>, transform_indices = @transform_3, window_bounds = array<i64: 1, 96>}, {pipeline_mode = #tpu.pipeline_mode<synchronous>, transform_indices = @transform_4, window_bounds = array<i64: 32, 32>}, {pipeline_mode = #tpu.pipeline_mode<synchronous>, transform_indices = @transform_5, window_bounds = array<i64: 1, 32>}, {pipeline_mode = #tpu.pipeline_mode<synchronous>, transform_indices = @transform_6, window_bounds = array<i64: 1, 32>}, {pipeline_mode = #tpu.pipeline_mode<synchronous>, transform_indices = @transform_7, window_bounds = array<i64: 1, 32>}, {pipeline_mode = #tpu.pipeline_mode<synchronous>, transform_indices = @transform_8, window_bounds = array<i64: 32, 64>}, {pipeline_mode = #tpu.pipeline_mode<synchronous>, transform_indices = @transform_9, window_bounds = array<i64: 1, 64>}, {pipeline_mode = #tpu.pipeline_mode<synchronous>, transform_indices = @transform_10, window_bounds = array<i64: 64, 32>}, {pipeline_mode = #tpu.pipeline_mode<synchronous>, transform_indices = @transform_11, window_bounds = array<i64: 1, 32>}, {pipeline_mode = #tpu.pipeline_mode<synchronous>, transform_indices = @transform_12, window_bounds = array<i64: 1, 32>}, {pipeline_mode = #tpu.pipeline_mode<synchronous>, transform_indices = @transform_13, window_bounds = array<i64: 1, 32>}, {transform_indices = @transform_14, window_bounds = array<i64: 1, 8, 32>}]} {
    %c0 = arith.constant 0 : index
    %c0_0 = arith.constant 0 : index
    %c0_1 = arith.constant 0 : index
    %0 = vector.load %arg1[%c0, %c0_0, %c0_1] : memref<1x8x32xf32, #tpu.memory_space<vmem>>, vector<1x8x32xf32>
    %1 = vector.shape_cast %0 : vector<1x8x32xf32> to vector<8x32xf32>
    %c0_2 = arith.constant 0 : index
    %c0_3 = arith.constant 0 : index
    %c0_4 = arith.constant 0 : index
    %2 = vector.load %arg2[%c0_2, %c0_3, %c0_4] : memref<1x1x8xf32, #tpu.memory_space<vmem>>, vector<1x1x8xf32>
    %3 = vector.shape_cast %2 : vector<1x1x8xf32> to vector<1x8xf32>
    %4 = arith.truncf %1 : vector<8x32xf32> to vector<8x32xbf16>
    %c0_5 = arith.constant 0 : index
    %c0_6 = arith.constant 0 : index
    %5 = vector.load %arg3[%c0_5, %c0_6] : memref<32x96xbf16, #tpu.memory_space<vmem>>, vector<32x96xbf16>
    %cst = arith.constant dense<0.000000e+00> : vector<8x96xf32>
    %6 = tpu.matmul %4, %5, %cst {dimension_numbers = #tpu.dot_dimension_numbers<[1], [0], [0], [1], [0, 0, 1, 1], [], []>} : vector<8x32xbf16>, vector<32x96xbf16>, vector<8x96xf32> -> vector<8x96xf32>
    %c0_7 = arith.constant 0 : index
    %c0_8 = arith.constant 0 : index
    %7 = vector.load %arg4[%c0_7, %c0_8] : memref<1x96xf32, #tpu.memory_space<vmem>>, vector<1x96xf32>
    %8 = vector.broadcast %7 : vector<1x96xf32> to vector<8x96xf32>
    %9 = arith.addf %6, %8 : vector<8x96xf32>
    %c0_9 = arith.constant 0 : index
    %c0_10 = arith.constant 0 : index
    %10 = vector.load %arg5[%c0_9, %c0_10] : memref<32x32xbf16, #tpu.memory_space<vmem>>, vector<32x32xbf16>
    %cst_11 = arith.constant 0.000000e+00 : f32
    %11 = vector.broadcast %cst_11 : f32 to vector<8x32xf32>
    %12 = vector.extract_strided_slice %9 {offsets = [0, 0], sizes = [8, 8], strides = [1, 1]} : vector<8x96xf32> to vector<8x8xf32>
    %13 = vector.extract_strided_slice %9 {offsets = [0, 32], sizes = [8, 8], strides = [1, 1]} : vector<8x96xf32> to vector<8x8xf32>
    %14 = vector.extract_strided_slice %9 {offsets = [0, 64], sizes = [8, 8], strides = [1, 1]} : vector<8x96xf32> to vector<8x8xf32>
    %15 = arith.truncf %12 : vector<8x8xf32> to vector<8x8xbf16>
    %16 = arith.truncf %13 : vector<8x8xf32> to vector<8x8xbf16>
    %cst_12 = arith.constant dense<0.000000e+00> : vector<8x8xf32>
    %17 = tpu.matmul %15, %16, %cst_12 {dimension_numbers = #tpu.dot_dimension_numbers<[1], [1], [0], [0], [0, 0, 1, 0], [], []>} : vector<8x8xbf16>, vector<8x8xbf16>, vector<8x8xf32> -> vector<8x8xf32>
    %cst_13 = arith.constant 0.353553385 : f32
    %18 = vector.broadcast %cst_13 : f32 to vector<8x8xf32>
    %19 = arith.mulf %17, %18 : vector<8x8xf32>
    %20 = vector.broadcast %3 : vector<1x8xf32> to vector<8x8xf32>
    %21 = arith.addf %19, %20 : vector<8x8xf32>
    %cst_14 = arith.constant dense<0xFF800000> : vector<8xf32>
    %22 = vector.multi_reduction <maximumf>, %21, %cst_14 [1] : vector<8x8xf32> to vector<8xf32>
    %23 = vector.shape_cast %22 : vector<8xf32> to vector<8x1xf32>
    %24 = vector.broadcast %23 : vector<8x1xf32> to vector<8x8xf32>
    %25 = arith.subf %21, %24 : vector<8x8xf32>
    %26 = math.exp %25 : vector<8x8xf32>
    %cst_15 = arith.constant dense<0.000000e+00> : vector<8xf32>
    %27 = vector.multi_reduction <add>, %26, %cst_15 [1] : vector<8x8xf32> to vector<8xf32>
    %28 = vector.shape_cast %27 : vector<8xf32> to vector<8x1xf32>
    %29 = tpu.reciprocal %28 {approx = true} : vector<8x1xf32> -> vector<8x1xf32>
    %30 = vector.broadcast %29 : vector<8x1xf32> to vector<8x8xf32>
    %31 = arith.mulf %26, %30 : vector<8x8xf32>
    %32 = arith.truncf %31 : vector<8x8xf32> to vector<8x8xbf16>
    %33 = arith.truncf %14 : vector<8x8xf32> to vector<8x8xbf16>
    %cst_16 = arith.constant dense<0.000000e+00> : vector<8x8xf32>
    %34 = tpu.matmul %32, %33, %cst_16 {dimension_numbers = #tpu.dot_dimension_numbers<[1], [0], [0], [1], [0, 0, 1, 1], [], []>} : vector<8x8xbf16>, vector<8x8xbf16>, vector<8x8xf32> -> vector<8x8xf32>
    %35 = arith.truncf %34 : vector<8x8xf32> to vector<8x8xbf16>
    %36 = vector.extract_strided_slice %10 {offsets = [0, 0], sizes = [8, 32], strides = [1, 1]} : vector<32x32xbf16> to vector<8x32xbf16>
    %cst_17 = arith.constant dense<0.000000e+00> : vector<8x32xf32>
    %37 = tpu.matmul %35, %36, %cst_17 {dimension_numbers = #tpu.dot_dimension_numbers<[1], [0], [0], [1], [0, 0, 1, 1], [], []>} : vector<8x8xbf16>, vector<8x32xbf16>, vector<8x32xf32> -> vector<8x32xf32>
    %38 = arith.addf %11, %37 : vector<8x32xf32>
    %39 = vector.extract_strided_slice %9 {offsets = [0, 8], sizes = [8, 8], strides = [1, 1]} : vector<8x96xf32> to vector<8x8xf32>
    %40 = vector.extract_strided_slice %9 {offsets = [0, 40], sizes = [8, 8], strides = [1, 1]} : vector<8x96xf32> to vector<8x8xf32>
    %41 = vector.extract_strided_slice %9 {offsets = [0, 72], sizes = [8, 8], strides = [1, 1]} : vector<8x96xf32> to vector<8x8xf32>
    %42 = arith.truncf %39 : vector<8x8xf32> to vector<8x8xbf16>
    %43 = arith.truncf %40 : vector<8x8xf32> to vector<8x8xbf16>
    %cst_18 = arith.constant dense<0.000000e+00> : vector<8x8xf32>
    %44 = tpu.matmul %42, %43, %cst_18 {dimension_numbers = #tpu.dot_dimension_numbers<[1], [1], [0], [0], [0, 0, 1, 0], [], []>} : vector<8x8xbf16>, vector<8x8xbf16>, vector<8x8xf32> -> vector<8x8xf32>
    %cst_19 = arith.constant 0.353553385 : f32
    %45 = vector.broadcast %cst_19 : f32 to vector<8x8xf32>
    %46 = arith.mulf %44, %45 : vector<8x8xf32>
    %47 = vector.broadcast %3 : vector<1x8xf32> to vector<8x8xf32>
    %48 = arith.addf %46, %47 : vector<8x8xf32>
    %cst_20 = arith.constant dense<0xFF800000> : vector<8xf32>
    %49 = vector.multi_reduction <maximumf>, %48, %cst_20 [1] : vector<8x8xf32> to vector<8xf32>
    %50 = vector.shape_cast %49 : vector<8xf32> to vector<8x1xf32>
    %51 = vector.broadcast %50 : vector<8x1xf32> to vector<8x8xf32>
    %52 = arith.subf %48, %51 : vector<8x8xf32>
    %53 = math.exp %52 : vector<8x8xf32>
    %cst_21 = arith.constant dense<0.000000e+00> : vector<8xf32>
    %54 = vector.multi_reduction <add>, %53, %cst_21 [1] : vector<8x8xf32> to vector<8xf32>
    %55 = vector.shape_cast %54 : vector<8xf32> to vector<8x1xf32>
    %56 = tpu.reciprocal %55 {approx = true} : vector<8x1xf32> -> vector<8x1xf32>
    %57 = vector.broadcast %56 : vector<8x1xf32> to vector<8x8xf32>
    %58 = arith.mulf %53, %57 : vector<8x8xf32>
    %59 = arith.truncf %58 : vector<8x8xf32> to vector<8x8xbf16>
    %60 = arith.truncf %41 : vector<8x8xf32> to vector<8x8xbf16>
    %cst_22 = arith.constant dense<0.000000e+00> : vector<8x8xf32>
    %61 = tpu.matmul %59, %60, %cst_22 {dimension_numbers = #tpu.dot_dimension_numbers<[1], [0], [0], [1], [0, 0, 1, 1], [], []>} : vector<8x8xbf16>, vector<8x8xbf16>, vector<8x8xf32> -> vector<8x8xf32>
    %62 = arith.truncf %61 : vector<8x8xf32> to vector<8x8xbf16>
    %63 = vector.extract_strided_slice %10 {offsets = [8, 0], sizes = [8, 32], strides = [1, 1]} : vector<32x32xbf16> to vector<8x32xbf16>
    %cst_23 = arith.constant dense<0.000000e+00> : vector<8x32xf32>
    %64 = tpu.matmul %62, %63, %cst_23 {dimension_numbers = #tpu.dot_dimension_numbers<[1], [0], [0], [1], [0, 0, 1, 1], [], []>} : vector<8x8xbf16>, vector<8x32xbf16>, vector<8x32xf32> -> vector<8x32xf32>
    %65 = arith.addf %38, %64 : vector<8x32xf32>
    %66 = vector.extract_strided_slice %9 {offsets = [0, 16], sizes = [8, 8], strides = [1, 1]} : vector<8x96xf32> to vector<8x8xf32>
    %67 = vector.extract_strided_slice %9 {offsets = [0, 48], sizes = [8, 8], strides = [1, 1]} : vector<8x96xf32> to vector<8x8xf32>
    %68 = vector.extract_strided_slice %9 {offsets = [0, 80], sizes = [8, 8], strides = [1, 1]} : vector<8x96xf32> to vector<8x8xf32>
    %69 = arith.truncf %66 : vector<8x8xf32> to vector<8x8xbf16>
    %70 = arith.truncf %67 : vector<8x8xf32> to vector<8x8xbf16>
    %cst_24 = arith.constant dense<0.000000e+00> : vector<8x8xf32>
    %71 = tpu.matmul %69, %70, %cst_24 {dimension_numbers = #tpu.dot_dimension_numbers<[1], [1], [0], [0], [0, 0, 1, 0], [], []>} : vector<8x8xbf16>, vector<8x8xbf16>, vector<8x8xf32> -> vector<8x8xf32>
    %cst_25 = arith.constant 0.353553385 : f32
    %72 = vector.broadcast %cst_25 : f32 to vector<8x8xf32>
    %73 = arith.mulf %71, %72 : vector<8x8xf32>
    %74 = vector.broadcast %3 : vector<1x8xf32> to vector<8x8xf32>
    %75 = arith.addf %73, %74 : vector<8x8xf32>
    %cst_26 = arith.constant dense<0xFF800000> : vector<8xf32>
    %76 = vector.multi_reduction <maximumf>, %75, %cst_26 [1] : vector<8x8xf32> to vector<8xf32>
    %77 = vector.shape_cast %76 : vector<8xf32> to vector<8x1xf32>
    %78 = vector.broadcast %77 : vector<8x1xf32> to vector<8x8xf32>
    %79 = arith.subf %75, %78 : vector<8x8xf32>
    %80 = math.exp %79 : vector<8x8xf32>
    %cst_27 = arith.constant dense<0.000000e+00> : vector<8xf32>
    %81 = vector.multi_reduction <add>, %80, %cst_27 [1] : vector<8x8xf32> to vector<8xf32>
    %82 = vector.shape_cast %81 : vector<8xf32> to vector<8x1xf32>
    %83 = tpu.reciprocal %82 {approx = true} : vector<8x1xf32> -> vector<8x1xf32>
    %84 = vector.broadcast %83 : vector<8x1xf32> to vector<8x8xf32>
    %85 = arith.mulf %80, %84 : vector<8x8xf32>
    %86 = arith.truncf %85 : vector<8x8xf32> to vector<8x8xbf16>
    %87 = arith.truncf %68 : vector<8x8xf32> to vector<8x8xbf16>
    %cst_28 = arith.constant dense<0.000000e+00> : vector<8x8xf32>
    %88 = tpu.matmul %86, %87, %cst_28 {dimension_numbers = #tpu.dot_dimension_numbers<[1], [0], [0], [1], [0, 0, 1, 1], [], []>} : vector<8x8xbf16>, vector<8x8xbf16>, vector<8x8xf32> -> vector<8x8xf32>
    %89 = arith.truncf %88 : vector<8x8xf32> to vector<8x8xbf16>
    %90 = vector.extract_strided_slice %10 {offsets = [16, 0], sizes = [8, 32], strides = [1, 1]} : vector<32x32xbf16> to vector<8x32xbf16>
    %cst_29 = arith.constant dense<0.000000e+00> : vector<8x32xf32>
    %91 = tpu.matmul %89, %90, %cst_29 {dimension_numbers = #tpu.dot_dimension_numbers<[1], [0], [0], [1], [0, 0, 1, 1], [], []>} : vector<8x8xbf16>, vector<8x32xbf16>, vector<8x32xf32> -> vector<8x32xf32>
    %92 = arith.addf %65, %91 : vector<8x32xf32>
    %93 = vector.extract_strided_slice %9 {offsets = [0, 24], sizes = [8, 8], strides = [1, 1]} : vector<8x96xf32> to vector<8x8xf32>
    %94 = vector.extract_strided_slice %9 {offsets = [0, 56], sizes = [8, 8], strides = [1, 1]} : vector<8x96xf32> to vector<8x8xf32>
    %95 = vector.extract_strided_slice %9 {offsets = [0, 88], sizes = [8, 8], strides = [1, 1]} : vector<8x96xf32> to vector<8x8xf32>
    %96 = arith.truncf %93 : vector<8x8xf32> to vector<8x8xbf16>
    %97 = arith.truncf %94 : vector<8x8xf32> to vector<8x8xbf16>
    %cst_30 = arith.constant dense<0.000000e+00> : vector<8x8xf32>
    %98 = tpu.matmul %96, %97, %cst_30 {dimension_numbers = #tpu.dot_dimension_numbers<[1], [1], [0], [0], [0, 0, 1, 0], [], []>} : vector<8x8xbf16>, vector<8x8xbf16>, vector<8x8xf32> -> vector<8x8xf32>
    %cst_31 = arith.constant 0.353553385 : f32
    %99 = vector.broadcast %cst_31 : f32 to vector<8x8xf32>
    %100 = arith.mulf %98, %99 : vector<8x8xf32>
    %101 = vector.broadcast %3 : vector<1x8xf32> to vector<8x8xf32>
    %102 = arith.addf %100, %101 : vector<8x8xf32>
    %cst_32 = arith.constant dense<0xFF800000> : vector<8xf32>
    %103 = vector.multi_reduction <maximumf>, %102, %cst_32 [1] : vector<8x8xf32> to vector<8xf32>
    %104 = vector.shape_cast %103 : vector<8xf32> to vector<8x1xf32>
    %105 = vector.broadcast %104 : vector<8x1xf32> to vector<8x8xf32>
    %106 = arith.subf %102, %105 : vector<8x8xf32>
    %107 = math.exp %106 : vector<8x8xf32>
    %cst_33 = arith.constant dense<0.000000e+00> : vector<8xf32>
    %108 = vector.multi_reduction <add>, %107, %cst_33 [1] : vector<8x8xf32> to vector<8xf32>
    %109 = vector.shape_cast %108 : vector<8xf32> to vector<8x1xf32>
    %110 = tpu.reciprocal %109 {approx = true} : vector<8x1xf32> -> vector<8x1xf32>
    %111 = vector.broadcast %110 : vector<8x1xf32> to vector<8x8xf32>
    %112 = arith.mulf %107, %111 : vector<8x8xf32>
    %113 = arith.truncf %112 : vector<8x8xf32> to vector<8x8xbf16>
    %114 = arith.truncf %95 : vector<8x8xf32> to vector<8x8xbf16>
    %cst_34 = arith.constant dense<0.000000e+00> : vector<8x8xf32>
    %115 = tpu.matmul %113, %114, %cst_34 {dimension_numbers = #tpu.dot_dimension_numbers<[1], [0], [0], [1], [0, 0, 1, 1], [], []>} : vector<8x8xbf16>, vector<8x8xbf16>, vector<8x8xf32> -> vector<8x8xf32>
    %116 = arith.truncf %115 : vector<8x8xf32> to vector<8x8xbf16>
    %117 = vector.extract_strided_slice %10 {offsets = [24, 0], sizes = [8, 32], strides = [1, 1]} : vector<32x32xbf16> to vector<8x32xbf16>
    %cst_35 = arith.constant dense<0.000000e+00> : vector<8x32xf32>
    %118 = tpu.matmul %116, %117, %cst_35 {dimension_numbers = #tpu.dot_dimension_numbers<[1], [0], [0], [1], [0, 0, 1, 1], [], []>} : vector<8x8xbf16>, vector<8x32xbf16>, vector<8x32xf32> -> vector<8x32xf32>
    %119 = arith.addf %92, %118 : vector<8x32xf32>
    %c0_36 = arith.constant 0 : index
    %c0_37 = arith.constant 0 : index
    %120 = vector.load %arg6[%c0_36, %c0_37] : memref<1x32xf32, #tpu.memory_space<vmem>>, vector<1x32xf32>
    %121 = vector.broadcast %120 : vector<1x32xf32> to vector<8x32xf32>
    %122 = arith.addf %119, %121 : vector<8x32xf32>
    %123 = arith.addf %1, %122 : vector<8x32xf32>
    %c0_38 = arith.constant 0 : index
    %c0_39 = arith.constant 0 : index
    %124 = vector.load %arg7[%c0_38, %c0_39] : memref<1x32xf32, #tpu.memory_space<vmem>>, vector<1x32xf32>
    %c0_40 = arith.constant 0 : index
    %c0_41 = arith.constant 0 : index
    %125 = vector.load %arg8[%c0_40, %c0_41] : memref<1x32xf32, #tpu.memory_space<vmem>>, vector<1x32xf32>
    %cst_42 = arith.constant dense<0.000000e+00> : vector<8xf32>
    %126 = vector.multi_reduction <add>, %123, %cst_42 [1] : vector<8x32xf32> to vector<8xf32>
    %127 = vector.shape_cast %126 : vector<8xf32> to vector<8x1xf32>
    %cst_43 = arith.constant 3.200000e+01 : f32
    %128 = vector.broadcast %cst_43 : f32 to vector<8x1xf32>
    %129 = arith.divf %127, %128 : vector<8x1xf32>
    %130 = vector.broadcast %129 : vector<8x1xf32> to vector<8x32xf32>
    %131 = arith.subf %123, %130 : vector<8x32xf32>
    %132 = arith.mulf %131, %131 : vector<8x32xf32>
    %cst_44 = arith.constant dense<0.000000e+00> : vector<8xf32>
    %133 = vector.multi_reduction <add>, %132, %cst_44 [1] : vector<8x32xf32> to vector<8xf32>
    %134 = vector.shape_cast %133 : vector<8xf32> to vector<8x1xf32>
    %cst_45 = arith.constant 3.200000e+01 : f32
    %135 = vector.broadcast %cst_45 : f32 to vector<8x1xf32>
    %136 = arith.divf %134, %135 : vector<8x1xf32>
    %137 = vector.broadcast %129 : vector<8x1xf32> to vector<8x32xf32>
    %138 = arith.subf %123, %137 : vector<8x32xf32>
    %cst_46 = arith.constant 9.99999996E-13 : f32
    %139 = vector.broadcast %cst_46 : f32 to vector<8x1xf32>
    %140 = arith.addf %136, %139 : vector<8x1xf32>
    %141 = math.rsqrt %140 : vector<8x1xf32>
    %142 = vector.broadcast %141 : vector<8x1xf32> to vector<8x32xf32>
    %143 = arith.mulf %138, %142 : vector<8x32xf32>
    %144 = vector.broadcast %124 : vector<1x32xf32> to vector<8x32xf32>
    %145 = arith.mulf %143, %144 : vector<8x32xf32>
    %146 = vector.broadcast %125 : vector<1x32xf32> to vector<8x32xf32>
    %147 = arith.addf %145, %146 : vector<8x32xf32>
    %148 = arith.truncf %147 : vector<8x32xf32> to vector<8x32xbf16>
    %c0_47 = arith.constant 0 : index
    %c0_48 = arith.constant 0 : index
    %149 = vector.load %arg9[%c0_47, %c0_48] : memref<32x64xbf16, #tpu.memory_space<vmem>>, vector<32x64xbf16>
    %cst_49 = arith.constant dense<0.000000e+00> : vector<8x64xf32>
    %150 = tpu.matmul %148, %149, %cst_49 {dimension_numbers = #tpu.dot_dimension_numbers<[1], [0], [0], [1], [0, 0, 1, 1], [], []>} : vector<8x32xbf16>, vector<32x64xbf16>, vector<8x64xf32> -> vector<8x64xf32>
    %c0_50 = arith.constant 0 : index
    %c0_51 = arith.constant 0 : index
    %151 = vector.load %arg10[%c0_50, %c0_51] : memref<1x64xf32, #tpu.memory_space<vmem>>, vector<1x64xf32>
    %152 = vector.broadcast %151 : vector<1x64xf32> to vector<8x64xf32>
    %153 = arith.addf %150, %152 : vector<8x64xf32>
    %154 = arith.mulf %153, %153 : vector<8x64xf32>
    %155 = arith.mulf %153, %154 : vector<8x64xf32>
    %cst_52 = arith.constant 4.471500e-02 : f32
    %156 = vector.broadcast %cst_52 : f32 to vector<8x64xf32>
    %157 = arith.mulf %156, %155 : vector<8x64xf32>
    %158 = arith.addf %153, %157 : vector<8x64xf32>
    %cst_53 = arith.constant 0.797884583 : f32
    %159 = vector.broadcast %cst_53 : f32 to vector<8x64xf32>
    %160 = arith.mulf %159, %158 : vector<8x64xf32>
    %161 = math.tanh %160 : vector<8x64xf32>
    %cst_54 = arith.constant 1.000000e+00 : f32
    %162 = vector.broadcast %cst_54 : f32 to vector<8x64xf32>
    %163 = arith.addf %162, %161 : vector<8x64xf32>
    %cst_55 = arith.constant 5.000000e-01 : f32
    %164 = vector.broadcast %cst_55 : f32 to vector<8x64xf32>
    %165 = arith.mulf %164, %163 : vector<8x64xf32>
    %166 = arith.mulf %153, %165 : vector<8x64xf32>
    %167 = arith.truncf %166 : vector<8x64xf32> to vector<8x64xbf16>
    %c0_56 = arith.constant 0 : index
    %c0_57 = arith.constant 0 : index
    %168 = vector.load %arg11[%c0_56, %c0_57] : memref<64x32xbf16, #tpu.memory_space<vmem>>, vector<64x32xbf16>
    %cst_58 = arith.constant dense<0.000000e+00> : vector<8x32xf32>
    %169 = tpu.matmul %167, %168, %cst_58 {dimension_numbers = #tpu.dot_dimension_numbers<[1], [0], [0], [1], [0, 0, 1, 1], [], []>} : vector<8x64xbf16>, vector<64x32xbf16>, vector<8x32xf32> -> vector<8x32xf32>
    %c0_59 = arith.constant 0 : index
    %c0_60 = arith.constant 0 : index
    %170 = vector.load %arg12[%c0_59, %c0_60] : memref<1x32xf32, #tpu.memory_space<vmem>>, vector<1x32xf32>
    %171 = vector.broadcast %170 : vector<1x32xf32> to vector<8x32xf32>
    %172 = arith.addf %169, %171 : vector<8x32xf32>
    %173 = arith.addf %147, %172 : vector<8x32xf32>
    %c0_61 = arith.constant 0 : index
    %c0_62 = arith.constant 0 : index
    %174 = vector.load %arg13[%c0_61, %c0_62] : memref<1x32xf32, #tpu.memory_space<vmem>>, vector<1x32xf32>
    %c0_63 = arith.constant 0 : index
    %c0_64 = arith.constant 0 : index
    %175 = vector.load %arg14[%c0_63, %c0_64] : memref<1x32xf32, #tpu.memory_space<vmem>>, vector<1x32xf32>
    %cst_65 = arith.constant dense<0.000000e+00> : vector<8xf32>
    %176 = vector.multi_reduction <add>, %173, %cst_65 [1] : vector<8x32xf32> to vector<8xf32>
    %177 = vector.shape_cast %176 : vector<8xf32> to vector<8x1xf32>
    %cst_66 = arith.constant 3.200000e+01 : f32
    %178 = vector.broadcast %cst_66 : f32 to vector<8x1xf32>
    %179 = arith.divf %177, %178 : vector<8x1xf32>
    %180 = vector.broadcast %179 : vector<8x1xf32> to vector<8x32xf32>
    %181 = arith.subf %173, %180 : vector<8x32xf32>
    %182 = arith.mulf %181, %181 : vector<8x32xf32>
    %cst_67 = arith.constant dense<0.000000e+00> : vector<8xf32>
    %183 = vector.multi_reduction <add>, %182, %cst_67 [1] : vector<8x32xf32> to vector<8xf32>
    %184 = vector.shape_cast %183 : vector<8xf32> to vector<8x1xf32>
    %cst_68 = arith.constant 3.200000e+01 : f32
    %185 = vector.broadcast %cst_68 : f32 to vector<8x1xf32>
    %186 = arith.divf %184, %185 : vector<8x1xf32>
    %187 = vector.broadcast %179 : vector<8x1xf32> to vector<8x32xf32>
    %188 = arith.subf %173, %187 : vector<8x32xf32>
    %cst_69 = arith.constant 9.99999996E-13 : f32
    %189 = vector.broadcast %cst_69 : f32 to vector<8x1xf32>
    %190 = arith.addf %186, %189 : vector<8x1xf32>
    %191 = math.rsqrt %190 : vector<8x1xf32>
    %192 = vector.broadcast %191 : vector<8x1xf32> to vector<8x32xf32>
    %193 = arith.mulf %188, %192 : vector<8x32xf32>
    %194 = vector.broadcast %174 : vector<1x32xf32> to vector<8x32xf32>
    %195 = arith.mulf %193, %194 : vector<8x32xf32>
    %196 = vector.broadcast %175 : vector<1x32xf32> to vector<8x32xf32>
    %197 = arith.addf %195, %196 : vector<8x32xf32>
    %c0_70 = arith.constant 0 : index
    %c0_71 = arith.constant 0 : index
    %c0_72 = arith.constant 0 : index
    %198 = vector.load %arg15[%c0_70, %c0_71, %c0_72] : memref<1x8x32xf32, #tpu.memory_space<vmem>>, vector<1x8x32xf32>
    %199 = vector.shape_cast %198 : vector<1x8x32xf32> to vector<8x32xf32>
    %200 = vector.shape_cast %197 : vector<8x32xf32> to vector<1x8x32xf32>
    tpu.vector_store %arg15[%c0_70, %c0_71, %c0_72], %200 {strides = array<i32>} : memref<1x8x32xf32, #tpu.memory_space<vmem>>, vector<1x8x32xf32>,
    return
  }
  func.func @transform_0(%arg0: i32) -> (i32, i32, i32) {
    %c0_i32 = arith.constant 0 : i32
    %c0_i32_0 = arith.constant 0 : i32
    %c0_i32_1 = arith.constant 0 : i32
    return %arg0, %c0_i32, %c0_i32_0 : i32, i32, i32
  }
  func.func @transform_1(%arg0: i32) -> (i32, i32, i32) {
    %c0_i32 = arith.constant 0 : i32
    %c0_i32_0 = arith.constant 0 : i32
    %c0_i32_1 = arith.constant 0 : i32
    return %arg0, %c0_i32, %c0_i32_0 : i32, i32, i32
  }
  func.func @transform_2(%arg0: i32) -> (i32, i32) {
    %c0_i32 = arith.constant 0 : i32
    %c0_i32_0 = arith.constant 0 : i32
    %c0_i32_1 = arith.constant 0 : i32
    return %c0_i32, %c0_i32_0 : i32, i32
  }
  func.func @transform_3(%arg0: i32) -> (i32, i32) {
    %c0_i32 = arith.constant 0 : i32
    %c0_i32_0 = arith.constant 0 : i32
    %c0_i32_1 = arith.constant 0 : i32
    return %c0_i32, %c0_i32_0 : i32, i32
  }
  func.func @transform_4(%arg0: i32) -> (i32, i32) {
    %c0_i32 = arith.constant 0 : i32
    %c0_i32_0 = arith.constant 0 : i32
    %c0_i32_1 = arith.constant 0 : i32
    return %c0_i32, %c0_i32_0 : i32, i32
  }
  func.func @transform_5(%arg0: i32) -> (i32, i32) {
    %c0_i32 = arith.constant 0 : i32
    %c0_i32_0 = arith.constant 0 : i32
    %c0_i32_1 = arith.constant 0 : i32
    return %c0_i32, %c0_i32_0 : i32, i32
  }
  func.func @transform_6(%arg0: i32) -> (i32, i32) {
    %c0_i32 = arith.constant 0 : i32
    %c0_i32_0 = arith.constant 0 : i32
    %c0_i32_1 = arith.constant 0 : i32
    return %c0_i32, %c0_i32_0 : i32, i32
  }
  func.func @transform_7(%arg0: i32) -> (i32, i32) {
    %c0_i32 = arith.constant 0 : i32
    %c0_i32_0 = arith.constant 0 : i32
    %c0_i32_1 = arith.constant 0 : i32
    return %c0_i32, %c0_i32_0 : i32, i32
  }
  func.func @transform_8(%arg0: i32) -> (i32, i32) {
    %c0_i32 = arith.constant 0 : i32
    %c0_i32_0 = arith.constant 0 : i32
    %c0_i32_1 = arith.constant 0 : i32
    return %c0_i32, %c0_i32_0 : i32, i32
  }
  func.func @transform_9(%arg0: i32) -> (i32, i32) {
    %c0_i32 = arith.constant 0 : i32
    %c0_i32_0 = arith.constant 0 : i32
    %c0_i32_1 = arith.constant 0 : i32
    return %c0_i32, %c0_i32_0 : i32, i32
  }
  func.func @transform_10(%arg0: i32) -> (i32, i32) {
    %c0_i32 = arith.constant 0 : i32
    %c0_i32_0 = arith.constant 0 : i32
    %c0_i32_1 = arith.constant 0 : i32
    return %c0_i32, %c0_i32_0 : i32, i32
  }
  func.func @transform_11(%arg0: i32) -> (i32, i32) {
    %c0_i32 = arith.constant 0 : i32
    %c0_i32_0 = arith.constant 0 : i32
    %c0_i32_1 = arith.constant 0 : i32
    return %c0_i32, %c0_i32_0 : i32, i32
  }
  func.func @transform_12(%arg0: i32) -> (i32, i32) {
    %c0_i32 = arith.constant 0 : i32
    %c0_i32_0 = arith.constant 0 : i32
    %c0_i32_1 = arith.constant 0 : i32
    return %c0_i32, %c0_i32_0 : i32, i32
  }
  func.func @transform_13(%arg0: i32) -> (i32, i32) {
    %c0_i32 = arith.constant 0 : i32
    %c0_i32_0 = arith.constant 0 : i32
    %c0_i32_1 = arith.constant 0 : i32
    return %c0_i32, %c0_i32_0 : i32, i32
  }
  func.func @transform_14(%arg0: i32) -> (i32, i32, i32) {
    %c0_i32 = arith.constant 0 : i32
    %c0_i32_0 = arith.constant 0 : i32
    %c0_i32_1 = arith.constant 0 : i32
    return %arg0, %c0_i32, %c0_i32_0 : i32, i32, i32
  }
}

</mosaic_0001>

<bundles_post_ra>
// kernel: sentiment_classifier_forward.4
= control target key start
LH: loop header
LB: loop body
LE: loop exit
PB: predicated region body
PF: predicated region fallthrough
CT: control target
= control target key end

     0   :  { %vm18_vm0 = vcmask 261120   ;;  %v95_v4 = vmov 32.0   ;;  %s140_s0 = inlined_call_operand.vmem [shape: f32[16,32], index: 0, kind: input, shape index: {}]   ;;  %s141_s1 = inlined_call_operand.vmem [shape: f32[1,32], index: 1, kind: input, shape index: {}]   ;;  %s142_s2 = inlined_call_operand.vmem [shape: f32[1,32], index: 2, kind: input, shape index: {}]   ;;  %s143_s3 = inlined_call_operand.vmem [shape: f32[16,32], index: 3, kind: output, shape index: {}]  }
   0x1   :  { %v14_v0 = vld [vmem:[%s140_s0] sm:$0xff]  ;;  %v15_v2 = vld [vmem:[%s140_s0 + $0x8] sm:$0xff]  ;;  %89 = vrcp.f32 %v95_v4 }
   0x2   :  { %v19_v1 = vsel %vm18_vm0, %v14_v0, 0.0  ;;  %v22_v3 = vsel %vm18_vm0, %v15_v2, 0.0  ;;  %v87_v35 = vld [vmem:[%s141_s1] ss:$0 sm:$0xff] }
   0x3   :  { %20 = vadd.xlane.f32.xlu0 %v19_v1  ;;  %v88_v38 = vld [vmem:[%s142_s2] ss:$0 sm:$0xff] }
   0x7   :  { %v90_v5 = vpop.eup %89 }
   0x8   :  { %v26_v6 = vmul.f32 32.0, %v90_v5  ;;  %vm30_vm1 = vweird.f32 %v90_v5 }
   0xa   :  { %v27_v7 = vsub.f32 1.0, %v26_v6 }
   0xb   :  { %23 = vadd.xlane.f32.xlu0 %v22_v3 }
   0xc   :  { %v28_v8 = vmul.f32 %v90_v5, %v27_v7 }
   0xe   :  { %v29_v9 = vadd.f32 %v90_v5, %v28_v8 }
  0x10   :  { %v31_v10 = vsel %vm30_vm1, %v90_v5, %v29_v9 }
  0x76   :  { %v21_v11 = vpop.xlane.xlu0 %20 }
  0x77   :  { %v32_v12 = vmul.f32 %v31_v10, %v21_v11 }
  0x79   :  { %v34_v13 = vsub.f32 %v14_v0, %v32_v12 }
  0x7b   :  { %v36_v14 = vmul.f32 %v34_v13, %v34_v13 }
  0x7d   :  { %v38_v15 = vsel %vm18_vm0, %v36_v14, 0.0 }
  0x7e   :  { %39 = vadd.xlane.f32.xlu1 %v38_v15  ;;  %v24_v16 = vpop.xlane.xlu0 %23 }
  0x7f   :  { %v33_v17 = vmul.f32 %v31_v10, %v24_v16 }
  0x81   :  { %v35_v18 = vsub.f32 %v15_v2, %v33_v17 }
  0x83   :  { %v37_v19 = vmul.f32 %v35_v18, %v35_v18 }
  0x85   :  { %v41_v20 = vsel %vm18_vm0, %v37_v19, 0.0 }
  0x86   :  { %42 = vadd.xlane.f32.xlu1 %v41_v20 }
  0xf1   :  { %v40_v21 = vpop.xlane.xlu1 %39 }
  0xf2   :  { %v44_v22 = vmul.f32 %v40_v21, %v31_v10 }
  0xf4   :  { %v46_v23 = vadd.f32 1e-12, %v44_v22 }
  0xf6   :  { %91 = vrsqrt.f32 %v46_v23  ;;  %vm54_vm3 = vweird.f32 %v46_v23 }
  0xf9   :  { %v43_v24 = vpop.xlane.xlu1 %42 }
  0xfa   :  { %v45_v25 = vmul.f32 %v43_v24, %v31_v10 }
  0xfc   :  { %v92_v26 = vpop.eup %91  ;;  %v47_v27 = vadd.f32 1e-12, %v45_v25 }
  0xfd   :  { %v49_v28 = vmul.f32 %v92_v26, %v46_v23  ;;  %vm55_vm2 = vweird.f32 %v92_v26 }
  0xfe   :  { %93 = vrsqrt.f32 %v47_v27  ;;  %vm56_vm4 = vmor %vm54_vm3, %vm55_vm2  ;;  %vm64_vm6 = vweird.f32 %v47_v27 }
  0xff   :  { %v50_v29 = vmul.f32 %v92_v26, %v49_v28 }
 0x101   :  { %v51_v30 = vmul.f32 0.5, %v50_v29 }
 0x103   :  { %v52_v31 = vsub.f32 1.5, %v51_v30 }
 0x104   :  { %v94_v32 = vpop.eup %93 }
 0x105   :  { %v53_v33 = vmul.f32 %v92_v26, %v52_v31  ;;  %v59_v34 = vmul.f32 %v94_v32, %v47_v27  ;;  %vm65_vm5 = vweird.f32 %v94_v32 }
 0x106   :  { %vm66_vm7 = vmor %vm64_vm6, %vm65_vm5 }
 0x107   :  { %v57_v36 = vsel %vm56_vm4, %v92_v26, %v53_v33  ;;  %v60_v37 = vmul.f32 %v94_v32, %v59_v34 }
 0x108   :  { %v68_v39 = vmul.f32 %v57_v36, %v34_v13 }
 0x109   :  { %v61_v40 = vmul.f32 0.5, %v60_v37 }
 0x10a   :  { %v73_v41 = vmul.f32 %v87_v35, %v68_v39 }
 0x10b   :  { %v62_v42 = vsub.f32 1.5, %v61_v40 }
 0x10c   :  { %v78_v43 = vadd.f32 %v88_v38, %v73_v41 }
 0x10d   :  { %v63_v44 = vmul.f32 %v94_v32, %v62_v42 }
 0x10e   :  { %80 = vst.msk [vmem:[%s143_s3] sm:$0xff] %vm18_vm0, %v78_v43 }
 0x10f   :  { %v67_v45 = vsel %vm66_vm7, %v94_v32, %v63_v44 }
 0x110   :  { %v69_v46 = vmul.f32 %v67_v45, %v35_v18 }
 0x112   :  { %v74_v47 = vmul.f32 %v87_v35, %v69_v46 }
 0x114   :  { %v79_v48 = vadd.f32 %v88_v38, %v74_v47 }
 0x116   :  { %81 = vst.msk [vmem:[%s143_s3 + $0x8] sm:$0xff] %vm18_vm0, %v79_v48 }

// kernel: sentiment_classifier_forward.7
= control target key start
LH: loop header
LB: loop body
LE: loop exit
PB: predicated region body
PF: predicated region fallthrough
CT: control target
= control target key end

     0   :  { %s224_s0 = inlined_call_operand.vmem [shape: f32[2,32], index: 0, kind: input, shape index: {}]   ;;  %s225_s1 = inlined_call_operand.vmem [shape: bf16[32,32], index: 1, kind: input, shape index: {}]   ;;  %s226_s2 = inlined_call_operand.vmem [shape: f32[1,32], index: 2, kind: input, shape index: {}]   ;;  %s227_s3 = inlined_call_operand.vmem [shape: bf16[32,128], index: 3, kind: input, shape index: {}]   ;;  %s228_s4 = inlined_call_operand.vmem [shape: f32[1,128], index: 4, kind: input, shape index: {}]   ;;  %s229_s5 = inlined_call_operand.hbm [shape: f32[2,128], index: 5, kind: output, shape index: {}]  }
   0x1   :  { %v135_v0 = vld [vmem:[%s225_s1 + $0x8] sm:$0xff]  ;;  %v134_v1 = vld [vmem:[%s225_s1] sm:$0xff] }
   0x2   :  { %54 = vmatpush.bf16.msra.mxu0 %v135_v0  ;;  %v22_v2 = vld [vmem:[%s224_s0] sm:$0x3] }
   0x3   :  { %10 = vsyncpa [#allocation3], 0  ;;  %v23_v3 = vpack.c.bf16 %v22_v2, %v22_v2  ;;  %vm44_vm0 = vcmask 261120   ;;  %v137_v4 = vld [vmem:[%s227_s3 + $0x8] sm:$0xff]  ;;  %v136_v5 = vld [vmem:[%s227_s3] sm:$0xff]  ;;  %s169_s30 = smov [#allocation2]  }
   0x4   :  { %92 = vmatpush.bf16.msra.mxu1 %v137_v4  ;;  %v139_v6 = vld [vmem:[%s226_s2] ss:$0 sm:$0xff]  ;;  %s105_s6 = sshll.u32 %s169_s30, 4  ;;  %s107_s8 = sshll.u32 %s229_s5, 4  ;;  %s106_s6 = int_to_ptr.vmem [resolvable:$true] %s105_s6  ;;  %s108_s8 = int_to_ptr.hbm [resolvable:$true] %s107_s8 }
   0x5   :  { %v140_v12 = vld [vmem:[%s228_s4] ss:$0 sm:$0xff] }
   0x6   :  { %55 = vmatpush.bf16.msra.mxu0 %v134_v1 }
   0x8   :  { %93 = vmatpush.bf16.msra.mxu1 %v136_v5 }
   0x9   :  { %124 = vmatmul.msk.bf16.vlgmr.msra.gmra.mxu0 %vm44_vm0, %v23_v3 }
  0x86   :  { %v57_v7 = vpop.f32.mrf.mxu0 }
  0x87   :  { %v58_v8 = vadd.f32 %v139_v6, %v57_v7 }
  0x89   :  { %141 = vtanh.f32 %v58_v8 }
  0x8e   :  { %v59_v9 = vpop.f32.mrf.mxu0 }
  0x8f   :  { %v142_v10 = vpop.eup %141 }
  0x90   :  { %v62_v11 = vpack.c.bf16 %v142_v10, %v142_v10 }
  0x92   :  { %133 = vmatmul.msk.bf16.vlgmr.msra.gmra.mxu1 %vm44_vm0, %v62_v11 }
 0x10f   :  { %v95_v13 = vpop.f32.mrf.mxu1 }
 0x110   :  { %v96_v14 = vadd.f32 %v140_v12, %v95_v13 }
 0x112   :  { %99 = vst [vmem:[#allocation2] sm:$0x3] %v96_v14 }
 0x113   :  { %110 = dma.vmem_to_hbm [thread:$0]  %s106_s6, 32, %s108_s8, [#allocation3]  }
 0x117   :  { %v97_v15 = vpop.f32.mrf.mxu1 }
 0x118   :  { %167 = dma.done.wait [#allocation3], 32  }
 0x119   :  { %168 = vsyncadd [#allocation3], 4294967264 }
 0x11a   :  { %115 = vsyncpa [#allocation3], 1 }

// kernel: sentiment_classifier_forward.5
= control target key start
LH: loop header
LB: loop body
LE: loop exit
PB: predicated region body
PF: predicated region fallthrough
CT: control target
= control target key end

     0   :  { %s1294_s29 = smov 0   ;;  %s1461_s0 = inlined_call_operand.vmem [shape: f32[2,8,32], index: 0, kind: input, shape index: {}]   ;;  %s1462_s1 = inlined_call_operand.vmem [shape: f32[2,1,8], index: 1, kind: input, shape index: {}]   ;;  %s1463_s2 = inlined_call_operand.vmem [shape: bf16[32,96], index: 2, kind: input, shape index: {}]   ;;  %s1464_s3 = inlined_call_operand.vmem [shape: f32[1,96], index: 3, kind: input, shape index: {}]   ;;  %s1465_s4 = inlined_call_operand.vmem [shape: bf16[32,32], index: 4, kind: input, shape index: {}]   ;;  %s1466_s5 = inlined_call_operand.vmem [shape: f32[1,32], index: 5, kind: input, shape index: {}]   ;;  %s1467_s6 = inlined_call_operand.vmem [shape: f32[1,32], index: 6, kind: input, shape index: {}]   ;;  %s1468_s7 = inlined_call_operand.vmem [shape: f32[1,32], index: 7, kind: input, shape index: {}]   ;;  %s1469_s8 = inlined_call_operand.vmem [shape: bf16[32,64], index: 8, kind: input, shape index: {}]   ;;  %s1470_s9 = inlined_call_operand.vmem [shape: f32[1,64], index: 9, kind: input, shape index: {}]   ;;  %s1471_s10 = inlined_call_operand.vmem [shape: bf16[64,32], index: 10, kind: input, shape index: {}]   ;;  %s1472_s11 = inlined_call_operand.vmem [shape: f32[1,32], index: 11, kind: input, shape index: {}]   ;;  %s1473_s12 = inlined_call_operand.vmem [shape: f32[1,32], index: 12, kind: input, shape index: {}]   ;;  %s1474_s13 = inlined_call_operand.vmem [shape: f32[1,32], index: 13, kind: input, shape index: {}]   ;;  %s1475_s14 = inlined_call_operand.vmem [shape: f32[2,8,32], index: 14, kind: output, shape index: {}]  }
   0x1 LB: > { %s1082_s30 = sadd.s32 4294967295, %s1205_s29   ;;  %p1086_p0 = scmp.ge.s32.totalorder %s1205_s29, 1  ;;  %s1205_s29 = sphi %s1294_s29, %s24_s29  }
   0x2   : > { %p419_p1 = scmp.lt.s32.totalorder %s1205_s29, 3 }
   0x4   : > { %p420_p2 = pnand %p1086_p0, %p419_p1 }
   0x5   : > { %p466_p3 = scmp.lt.s32.totalorder (!%p420_p2), %s1082_s30, 1  ;;  %s1207_s28 = smov (!%p420_p2), 88  }
   0x6   : > { %423 = sbr.rel (%p420_p2) target bundleno = 2305 (0x901), region = 76  ;;  %s1208_s15 = smov (!%p420_p2), 96  }
   0x7   : > { %s1209_s16 = smov (!%p420_p2), 120   ;;  %s1210_s17 = smov (!%p420_p2), 80  }
   0x8   : > { %s1211_s18 = smov (!%p420_p2), 72   ;;  %s1212_s20 = smov (!%p420_p2), 112  }
   0x9   : > { %s1214_s26 = smov (!%p420_p2), 40   ;;  %s1215_s27 = smov (!%p420_p2), 64  }
   0xb   : > { %v1139_v0 = vld [vmem:[%s1463_s2 + $0x8] sm:$0xff]  ;;  %v1138_v1 = vld [vmem:[%s1463_s2] sm:$0xff]  ;;  %s1477_s30 = smov (!%p466_p3, %s1082_s30), 1  ;;  %vm501_vm0 = vcmask 261120   ;;  %vm526_vm1 = vcmask 64512   ;;  %vm568_vm2 = vcmask 1043456  }
   0xc   : > { %511 = vmatpush.bf16.msra.mxu0 %v1139_v0  ;;  %s1087_s19 = sshll.u32 %s1477_s30, 3  ;;  %s472_s22 = scalar_lea.vmem %s1462_s1, %s1477_s30  ;;  %v1166_v4 = vld [vmem:[%s1464_s3] ss:$0 sm:$0xff]  ;;  %v519_v62 = vld [vmem:[%s1465_s4 + $0x4] sm:$0xf]  ;;  %vm969_vm7 = vcmask 523264  }
   0xd   : > { %s469_s25 = scalar_lea.vmem %s1461_s0, %s1087_s19  ;;  %v518_v14 = vld [vmem:[%s1465_s4] sm:$0xf]  ;;  %v649_v63 = vsel %vm568_vm2, %v519_v62, 0 }
   0xe   : > { %v1320_v2 = vld [vmem:[%s469_s25] sm:$0xff]  ;;  %v668_v17 = vsel %vm568_vm2, %v518_v14, 0 }
   0xf   : > { %v480_v3 = vpack.c.bf16 %v1320_v2, %v1320_v2  ;;  %v1353_v21 = vld [vmem:[%s472_s22] ss:$0 sm:$0xff]  ;;  %s1213_s22 = smov 56  }
  0x10   : > { %512 = vmatpush.bf16.msra.mxu0 %v1138_v1 }
  0x13   : > { %1097 = vmatmul.msk.bf16.vlgmr.msra.gmra.mxu0 %vm501_vm0, %v480_v3 }
  0x14   : > { %658 = vmatpush.bf16.msrb.mxu0 %v649_v63 }
  0x90   : > { %v514_v5 = vpop.f32.mrf.mxu0 }
  0x91   : > { %v515_v6 = vadd.f32 %v1166_v4, %v514_v5 }
  0x93   : > { %v1328_v7 = vpack.c.bf16 %v515_v6, %v515_v6 }
  0x95   : > { %588 = vrot.lane.b32.xlu2 %v1328_v7, %s1207_s28  ;;  %524 = vrot.lane.b32.xlu0 %v1328_v7, %s1208_s15  ;;  %s1216_s28 = smov 104  }
  0x98   : > { %v516_v8 = vpop.f32.mrf.mxu0 }
  0x9d   : > { %586 = vrot.lane.b32.xlu2 %v1328_v7, %s1209_s16 }
  0xa5   : > { %685 = vrot.lane.b32.xlu2 %v1328_v7, %s1210_s17  ;;  %s1217_s17 = smov 48  }
  0xad   : > { %764 = vrot.lane.b32.xlu2 %v1328_v7, %s1211_s18 }
  0xb5   : > { %683 = vrot.lane.b32.xlu2 %v1328_v7, %s1212_s20 }
  0xef   : > { %v589_v9 = vpop.permute.xlu2 %588 }
  0xf0   : > { %v594_v10 = vsel %vm526_vm1, %v589_v9, 0 }
  0xf1   : > { %603 = vmatpush.bf16.xpose.msra.mxu3 %v594_v10 }
  0xf7   : > { %v587_v11 = vpop.permute.xlu2 %586 }
  0xf8   : > { %1100 = vmatmul.msk.bf16.vlgmr.msra.gmra.mxu3 %vm526_vm1, %v587_v11 }
  0xff   : > { %v686_v12 = vpop.permute.xlu2 %685 }
 0x100   : > { %v691_v13 = vsel %vm526_vm1, %v686_v12, 0 }
 0x101   : > { %700 = vmatpush.bf16.xpose.msrb.mxu3 %v691_v13 }
 0x107   : > { %v765_v15 = vpop.permute.xlu2 %764  ;;  %v525_v16 = vpop.permute.xlu0 %524 }
 0x108   : > { %v531_v18 = vsel %vm526_vm1, %v525_v16, 0  ;;  %v770_v20 = vsel %vm526_vm1, %v765_v15, 0 }
 0x109   : > { %540 = vmatpush.bf16.xpose.msra.mxu1 %v531_v18 }
 0x10f   : > { %v684_v19 = vpop.permute.xlu2 %683 }
 0x110   : > { %1098 = vmatmul.msk.bf16.vlgmr.msra.gmra.mxu1 %vm526_vm1, %v1328_v7  ;;  %1104 = vmatmul.msk.bf16.vlgmr.msrb.gmra.mxu3 %vm526_vm1, %v684_v19 }
 0x111   : > { %677 = vmatpush.bf16.msrb.mxu1 %v668_v17 }
 0x115   : > { %779 = vmatpush.bf16.xpose.msra.mxu1 %v770_v20 }
 0x17b   : > { %v605_v22 = vpop.f32.mrf.mxu3 }
 0x17c   : > { %v609_v23 = vmul.f32 0.35355338, %v605_v22 }
 0x17e   : > { %v610_v24 = vadd.f32 %v1353_v21, %v609_v23 }
 0x180   : > { %v611_v25 = vsel %vm526_vm1, %v610_v24, -inf }
 0x181   : > { %612 = vmax.xlane.f32.xlu2 %v611_v25 }
 0x183   : > { %v607_v26 = vpop.f32.mrf.mxu3 }
 0x18d   : > { %v542_v27 = vpop.f32.mrf.mxu1 }
 0x18e   : > { %v546_v28 = vmul.f32 0.35355338, %v542_v27 }
 0x190   : > { %v550_v29 = vadd.f32 %v1353_v21, %v546_v28 }
 0x192   : > { %v551_v30 = vsel %vm526_vm1, %v550_v29, -inf }
 0x193   : > { %v702_v31 = vpop.f32.mrf.mxu3  ;;  %552 = vmax.xlane.f32.xlu0 %v551_v30 }
 0x194   : > { %v706_v32 = vmul.f32 0.35355338, %v702_v31  ;;  %v521_v31 = vld [vmem:[%s1465_s4 + $0xc] sm:$0xf] }
 0x195   : > { %v544_v33 = vpop.f32.mrf.mxu1 }
 0x196   : > { %v1360_v34 = vadd.f32 %v1353_v21, %v706_v32 }
 0x198   : > { %v708_v35 = vsel %vm526_vm1, %v1360_v34, -inf }
 0x19b   : > { %v704_v36 = vpop.f32.mrf.mxu3  ;;  %709 = vmax.xlane.f32.xlu0 %v708_v35 }
 0x19c   : > { %v825_v36 = vsel %vm568_vm2, %v521_v31, 0 }
 0x1f4   : > { %v613_v37 = vpop.xlane.xlu2 %612 }
 0x1f5   : > { %v614_v38 = vsub.f32 %v610_v24, %v613_v37 }
 0x1f7   : > { %v615_v39 = vmul.f32 1.442695, %v614_v38 }
 0x1f9   : > { %1175 = vpow2.f32 %v615_v39  ;;  %v520_v39 = vld [vmem:[%s1465_s4 + $0x8] sm:$0xf] }
 0x1ff   : > { %v1176_v40 = vpop.eup %1175 }
 0x200   : > { %v617_v41 = vsel %vm526_vm1, %v1176_v40, 0.0 }
 0x201   : > { %618 = vadd.xlane.f32.xlu0 %v617_v41 }
 0x206   : > { %v553_v42 = vpop.xlane.xlu0 %552 }
 0x207   : > { %v554_v43 = vsub.f32 %v550_v29, %v553_v42 }
 0x209   : > { %v555_v44 = vmul.f32 1.442695, %v554_v43 }
 0x20b   : > { %1177 = vpow2.f32 %v555_v44 }
 0x20e   : > { %v710_v47 = vpop.xlane.xlu0 %709 }
 0x20f   : > { %v711_v11 = vsub.f32 %v1360_v34, %v710_v47 }
 0x211   : > { %v1178_v45 = vpop.eup %1177  ;;  %v712_v12 = vmul.f32 1.442695, %v711_v11 }
 0x212   : > { %v557_v46 = vsel %vm526_vm1, %v1178_v45, 0.0 }
 0x213   : > { %558 = vadd.xlane.f32.xlu1 %v557_v46 }
 0x215   : > { %623 = vrot.lane.b32.xlu0 %v1328_v7, %s1213_s22  ;;  %s476_s22 = scalar_lea.vmem %s1475_s14, %s1087_s19 }
 0x21d   : > { %799 = vrot.lane.b32.xlu0 %v1328_v7, %s1214_s26 }
 0x22c   : > { %563 = vrot.lane.b32.xlu1 %v1328_v7, %s1215_s27 }
 0x234   : > { %762 = vrot.lane.b32.xlu1 %v1328_v7, %s1216_s28 }
 0x274   : > { %v619_v48 = vpop.xlane.xlu0 %618 }
 0x286   : > { %v559_v52 = vpop.xlane.xlu1 %558 }
 0x287   : > { %v624_v49 = vpop.permute.xlu0 %623  ;;  %1179 = vrcp.f32 %v559_v52 }
 0x288   : > { %v629_v57 = vsel %vm568_vm2, %v624_v49, 0  ;;  %1181 = vrcp.f32 %v619_v48  ;;  %v1168_v49 = vld [vmem:[%s1466_s5] ss:$0 sm:$0xff] }
 0x289   : > { %1183 = vpow2.f32 %v712_v12 }
 0x28d   : > { %v1180_v53 = vpop.eup %1179 }
 0x28e   : > { %v561_v54 = vmul.f32 %v1180_v53, %v1178_v45  ;;  %v1182_v59 = vpop.eup %1181 }
 0x28f   : > { %v800_v50 = vpop.permute.xlu0 %799  ;;  %v621_v60 = vmul.f32 %v1182_v59, %v1176_v40  ;;  %v1184_v22 = vpop.eup %1183  ;;  %v746_v40 = vsel %vm568_vm2, %v520_v39, 0 }
 0x290   : > { %v805_v51 = vsel %vm568_vm2, %v800_v50, 0  ;;  %v562_v58 = vpack.c.bf16 %v561_v54, %v561_v54  ;;  %v714_v23 = vsel %vm526_vm1, %v1184_v22, 0.0  ;;  %755 = vmatpush.bf16.msra.mxu0 %v746_v40 }
 0x291   : > { %814 = vmatpush.bf16.msra.mxu3 %v805_v51  ;;  %v622_v61 = vpack.c.bf16 %v621_v60, %v621_v60 }
 0x29e   : > { %v564_v55 = vpop.permute.xlu1 %563 }
 0x29f   : > { %v570_v56 = vsel %vm568_vm2, %v564_v55, 0 }
 0x2a0   : > { %579 = vmatpush.bf16.msra.mxu2 %v570_v56 }
 0x2a3   : > { %1099 = vmatmul.msk.bf16.vlgmr.msra.gmra.mxu2 %vm526_vm1, %v562_v58 }
 0x2a4   : > { %638 = vmatpush.bf16.msrb.mxu2 %v629_v57  ;;  %v1218_v57 = vmov 32.0  }
 0x2a6   : > { %v763_v6 = vpop.permute.xlu1 %762 }
 0x2b3   : > { %1101 = vmatmul.msk.bf16.vlgmr.msrb.gmra.mxu2 %vm526_vm1, %v622_v61 }
 0x326   : > { %v581_v0 = vpop.f32.mrf.mxu2 }
 0x327   : > { %v585_v1 = vpack.c.bf16 %v581_v0, %v581_v0 }
 0x329   : > { %1103 = vmatmul.msk.bf16.vlgmr.msrb.gmra.mxu1 %vm526_vm1, %v585_v1 }
 0x32e   : > { %v583_v3 = vpop.f32.mrf.mxu2 }
 0x336   : > { %v640_v4 = vpop.f32.mrf.mxu2 }
 0x337   : > { %v644_v5 = vpack.c.bf16 %v640_v4, %v640_v4 }
 0x339   : > { %1102 = vmatmul.msk.bf16.vlgmr.msrb.gmra.mxu0 %vm526_vm1, %v644_v5  ;;  %1107 = vmatmul.msk.bf16.vlgmr.msra.gmra.mxu1 %vm526_vm1, %v763_v6  ;;  %v1141_v5 = vld [vmem:[%s1469_s8 + $0x8] sm:$0xff]  ;;  %v1140_v6 = vld [vmem:[%s1469_s8] sm:$0xff] }
 0x33a   : > { %916 = vmatpush.bf16.msrb.mxu0 %v1141_v5 }
 0x33e   : > { %v642_v8 = vpop.f32.mrf.mxu2  ;;  %917 = vmatpush.bf16.msrb.mxu0 %v1140_v6 }
 0x3a6   : > { %v679_v9 = vpop.f32.mrf.mxu1 }
 0x3ae   : > { %v681_v10 = vpop.f32.mrf.mxu1 }
 0x3b6   : > { %v660_v13 = vpop.f32.mrf.mxu0  ;;  %v781_v14 = vpop.f32.mrf.mxu1 }
 0x3b7   : > { %v680_v15 = vadd.f32 %v679_v9, %v660_v13  ;;  %v785_v16 = vmul.f32 0.35355338, %v781_v14 }
 0x3b9   : > { %v786_v17 = vadd.f32 %v1353_v21, %v785_v16 }
 0x3bb   : > { %v787_v18 = vsel %vm526_vm1, %v786_v17, -inf }
 0x3bc   : > { %788 = vmax.xlane.f32.xlu1 %v787_v18 }
 0x3be   : > { %v662_v19 = vpop.f32.mrf.mxu0  ;;  %v783_v20 = vpop.f32.mrf.mxu1 }
 0x3bf   : > { %v1170_v19 = vld [vmem:[%s1468_s7] ss:$0 sm:$0xff] }
 0x3c4   : > { %715 = vadd.xlane.f32.xlu1 %v714_v23 }
 0x42f   : > { %v789_v24 = vpop.xlane.xlu1 %788 }
 0x430   : > { %v790_v25 = vsub.f32 %v786_v17, %v789_v24  ;;  %v1169_v17 = vld [vmem:[%s1467_s6] ss:$0 sm:$0xff] }
 0x432   : > { %v791_v26 = vmul.f32 1.442695, %v790_v25  ;;  %v1145_v25 = vld [vmem:[%s1471_s10 + $0x18] sm:$0xff] }
 0x433   : > { %977 = vmatpush.bf16.msrb.mxu1 %v1145_v25 }
 0x434   : > { %1185 = vpow2.f32 %v791_v26  ;;  %v1144_v26 = vld [vmem:[%s1471_s10 + $0x10] sm:$0xff] }
 0x437   : > { %v716_v21 = vpop.xlane.xlu1 %715  ;;  %978 = vmatpush.bf16.msrb.mxu1 %v1144_v26 }
 0x438   : > { %1187 = vrcp.f32 %v716_v21  ;;  %v1171_v21 = vld [vmem:[%s1470_s9] ss:$0 sm:$0xff] }
 0x43a   : > { %v1186_v27 = vpop.eup %1185 }
 0x43b   : > { %v793_v28 = vsel %vm526_vm1, %v1186_v27, 0.0 }
 0x43c   : > { %794 = vadd.xlane.f32.xlu2 %v793_v28  ;;  %v1142_v28 = vld [vmem:[%s1471_s10] sm:$0xff] }
 0x43e   : > { %v1188_v30 = vpop.eup %1187 }
 0x43f   : > { %v718_v33 = vmul.f32 %v1188_v30, %v1184_v22 }
 0x454   : > { %720 = vrot.lane.b32.xlu2 %v1328_v7, %s1217_s17  ;;  %v719_v7 = vpack.c.bf16 %v718_v33, %v718_v33 }
 0x4af   : > { %v795_v29 = vpop.xlane.xlu2 %794 }
 0x4b0   : > { %1189 = vrcp.f32 %v795_v29 }
 0x4b1   : > { %1191 = vrcp.f32 %v1218_v57 }
 0x4b6   : > { %v1190_v32 = vpop.eup %1189 }
 0x4b7   : > { %v797_v34 = vmul.f32 %v1190_v32, %v1186_v27  ;;  %v721_v35 = vpop.permute.xlu2 %720  ;;  %v1192_v58 = vpop.eup %1191  ;;  %v1143_v27 = vld [vmem:[%s1471_s10 + $0x8] sm:$0xff] }
 0x4b8   : > { %v726_v37 = vsel %vm568_vm2, %v721_v35, 0  ;;  %v853_v59 = vmul.f32 32.0, %v1192_v58  ;;  %vm857_vm3 = vweird.f32 %v1192_v58  ;;  %979 = vmatpush.bf16.msrb.mxu1 %v1143_v27 }
 0x4b9   : > { %v798_v38 = vpack.c.bf16 %v797_v34, %v797_v34  ;;  %735 = vmatpush.bf16.msra.mxu2 %v726_v37 }
 0x4ba   : > { %v854_v60 = vsub.f32 1.0, %v853_v59 }
 0x4bb   : > { %1108 = vmatmul.msk.bf16.vlgmr.msra.gmra.mxu3 %vm526_vm1, %v798_v38 }
 0x4bc   : > { %1105 = vmatmul.msk.bf16.vlgmr.msra.gmra.mxu2 %vm526_vm1, %v719_v7  ;;  %v855_v61 = vmul.f32 %v1192_v58, %v854_v60  ;;  %980 = vmatpush.bf16.msrb.mxu1 %v1142_v28 }
 0x4bd   : > { %834 = vmatpush.bf16.msrb.mxu2 %v825_v36 }
 0x4be   : > { %v856_v62 = vadd.f32 %v1192_v58, %v855_v61  ;;  %v1173_v61 = vld [vmem:[%s1473_s12] ss:$0 sm:$0xff] }
 0x4c0   : > { %v1406_v63 = vsel %vm857_vm3, %v1192_v58, %v856_v62 }
 0x53e   : > { %v816_v41 = vpop.f32.mrf.mxu3 }
 0x53f   : > { %v820_v42 = vpack.c.bf16 %v816_v41, %v816_v41  ;;  %v737_v43 = vpop.f32.mrf.mxu2  ;;  %v1172_v41 = vld [vmem:[%s1472_s11] ss:$0 sm:$0xff] }
 0x540   : > { %v741_v44 = vpack.c.bf16 %v737_v43, %v737_v43 }
 0x541   : > { %1109 = vmatmul.msk.bf16.vlgmr.msrb.gmra.mxu2 %vm526_vm1, %v820_v42 }
 0x542   : > { %1106 = vmatmul.msk.bf16.vlgmr.msra.gmra.mxu0 %vm526_vm1, %v741_v44 }
 0x546   : > { %v818_v45 = vpop.f32.mrf.mxu3 }
 0x547   : > { %v739_v46 = vpop.f32.mrf.mxu2 }
 0x5bf   : > { %v757_v47 = vpop.f32.mrf.mxu0 }
 0x5c0   : > { %v761_v48 = vadd.f32 %v757_v47, %v680_v15 }
 0x5c4   : > { %v836_v50 = vpop.f32.mrf.mxu2 }
 0x5c5   : > { %v840_v51 = vadd.f32 %v836_v50, %v761_v48 }
 0x5c7   : > { %v845_v52 = vadd.f32 %v1168_v49, %v840_v51  ;;  %v759_v53 = vpop.f32.mrf.mxu0 }
 0x5c9   : > { %v846_v54 = vadd.f32 %v845_v52, %v1320_v2 }
 0x5cb   : > { %v849_v55 = vsel %vm501_vm0, %v846_v54, 0.0 }
 0x5cc   : > { %v838_v56 = vpop.f32.mrf.mxu2  ;;  %850 = vadd.xlane.f32.xlu1 %v849_v55 }
 0x63f   : > { %v851_v0 = vpop.xlane.xlu1 %850 }
 0x640   : > { %v859_v1 = vmul.f32 %v1406_v63, %v851_v0 }
 0x642   : > { %v860_v3 = vsub.f32 %v846_v54, %v859_v1 }
 0x644   : > { %v861_v4 = vmul.f32 %v860_v3, %v860_v3 }
 0x646   : > { %v862_v2 = vsel %vm501_vm0, %v861_v4, 0.0 }
 0x647   : > { %863 = vadd.xlane.f32.xlu0 %v862_v2 }
 0x6ba   : > { %v864_v8 = vpop.xlane.xlu0 %863 }
 0x6bb   : > { %v865_v9 = vmul.f32 %v864_v8, %v1406_v63 }
 0x6bd   : > { %v866_v10 = vadd.f32 1e-12, %v865_v9 }
 0x6bf   : > { %1193 = vrsqrt.f32 %v866_v10  ;;  %vm873_vm5 = vweird.f32 %v866_v10 }
 0x6c5   : > { %v1194_v11 = vpop.eup %1193 }
 0x6c6   : > { %v868_v12 = vmul.f32 %v1194_v11, %v866_v10  ;;  %vm874_vm4 = vweird.f32 %v1194_v11 }
 0x6c7   : > { %vm875_vm6 = vmor %vm873_vm5, %vm874_vm4 }
 0x6c8   : > { %v869_v13 = vmul.f32 %v1194_v11, %v868_v12 }
 0x6ca   : > { %v870_v14 = vmul.f32 0.5, %v869_v13 }
 0x6cc   : > { %v871_v15 = vsub.f32 1.5, %v870_v14 }
 0x6ce   : > { %v872_v16 = vmul.f32 %v1194_v11, %v871_v15 }
 0x6d0   : > { %v876_v18 = vsel %vm875_vm6, %v1194_v11, %v872_v16 }
 0x6d1   : > { %v877_v20 = vmul.f32 %v876_v18, %v860_v3 }
 0x6d3   : > { %v881_v22 = vmul.f32 %v1169_v17, %v877_v20 }
 0x6d5   : > { %v885_v23 = vadd.f32 %v1170_v19, %v881_v22 }
 0x6d7   : > { %v886_v24 = vpack.c.bf16 %v885_v23, %v885_v23 }
 0x6d9   : > { %1118 = vmatmul.msk.bf16.vlgmr.msrb.gmra.mxu0 %vm501_vm0, %v886_v24 }
 0x756   : > { %v919_v29 = vpop.f32.mrf.mxu0 }
 0x757   : > { %v920_v30 = vadd.f32 %v1171_v21, %v919_v29 }
 0x759   : > { %v923_v31 = vmul.f32 %v920_v30, %v920_v30 }
 0x75b   : > { %v924_v32 = vmul.f32 %v923_v31, %v920_v30 }
 0x75d   : > { %v925_v33 = vmul.f32 0.044715, %v924_v32 }
 0x75e   : > { %v921_v34 = vpop.f32.mrf.mxu0 }
 0x75f   : > { %v926_v35 = vadd.f32 %v925_v33, %v920_v30 }
 0x761   : > { %v927_v36 = vmul.f32 0.7978846, %v926_v35 }
 0x763   : > { %1195 = vtanh.f32 %v927_v36 }
 0x769   : > { %v1196_v37 = vpop.eup %1195 }
 0x76a   : > { %v929_v38 = vadd.f32 1.0, %v1196_v37 }
 0x76c   : > { %v930_v7 = vmul.f32 0.5, %v929_v38 }
 0x76e   : > { %v931_v39 = vmul.f32 %v930_v7, %v920_v30 }
 0x770   : > { %v932_v40 = vpack.c.bf16 %v931_v39, %v931_v39 }
 0x772   : > { %1135 = vmatmul.msk.bf16.vlgmr.msrb.gmra.mxu1 %vm969_vm7, %v932_v40 }
 0x7ef   : > { %v982_v42 = vpop.f32.mrf.mxu1 }
 0x7f0   : > { %v983_v43 = vadd.f32 %v1172_v41, %v982_v42 }
 0x7f2   : > { %v986_v44 = vadd.f32 %v983_v43, %v885_v23 }
 0x7f4   : > { %v989_v45 = vsel %vm501_vm0, %v986_v44, 0.0 }
 0x7f5   : > { %990 = vadd.xlane.f32.xlu1 %v989_v45 }
 0x7f7   : > { %v984_v46 = vpop.f32.mrf.mxu1 }
 0x868   : > { %v991_v47 = vpop.xlane.xlu1 %990 }
 0x869   : > { %v992_v48 = vmul.f32 %v991_v47, %v1406_v63 }
 0x86b   : > { %v993_v49 = vsub.f32 %v986_v44, %v992_v48 }
 0x86d   : > { %v994_v50 = vmul.f32 %v993_v49, %v993_v49 }
 0x86f   : > { %v995_v51 = vsel %vm501_vm0, %v994_v50, 0.0 }
 0x870   : > { %996 = vadd.xlane.f32.xlu1 %v995_v51 }
 0x8e3   : > { %v997_v52 = vpop.xlane.xlu1 %996 }
 0x8e4   : > { %v998_v53 = vmul.f32 %v997_v52, %v1406_v63  ;;  %v1174_v63 = vld [vmem:[%s1474_s13] ss:$0 sm:$0xff] }
 0x8e6   : > { %v999_v54 = vadd.f32 1e-12, %v998_v53 }
 0x8e8   : > { %1197 = vrsqrt.f32 %v999_v54  ;;  %vm1006_vm9 = vweird.f32 %v999_v54 }
 0x8ee   : > { %v1198_v55 = vpop.eup %1197 }
 0x8ef   : > { %v1001_v56 = vmul.f32 %v1198_v55, %v999_v54  ;;  %vm1007_vm8 = vweird.f32 %v1198_v55 }
 0x8f0   : > { %vm1008_vm10 = vmor %vm1006_vm9, %vm1007_vm8 }
 0x8f1   : > { %v1002_v57 = vmul.f32 %v1198_v55, %v1001_v56 }
 0x8f3   : > { %v1003_v58 = vmul.f32 0.5, %v1002_v57 }
 0x8f5   : > { %v1004_v59 = vsub.f32 1.5, %v1003_v58 }
 0x8f7   : > { %v1005_v60 = vmul.f32 %v1198_v55, %v1004_v59 }
 0x8f9   : > { %v1009_v62 = vsel %vm1008_vm10, %v1198_v55, %v1005_v60 }
 0x8fa   : > { %v1010_v0 = vmul.f32 %v1009_v62, %v993_v49 }
 0x8fc   : > { %v1014_v1 = vmul.f32 %v1173_v61, %v1010_v0 }
 0x8fe   : > { %v1018_v3 = vadd.f32 %v1174_v63, %v1014_v1 }
 0x900   : > { %1019 = vst.msk [vmem:[%s476_s22] sm:$0xff] %vm501_vm0, %v1018_v3 }
 0x901 PF: > { %s24_s29 = sadd.s32 1, %s1205_s29  }
 0x902   : > { %p21_p4 = scmp.ge.s32.totalorder %s24_s29, 4  }
 0x904   :  { %23 = sbr.rel (!%p21_p4) target bundleno = 1 (0x1), region = 109 }

</bundles_post_ra>
